<compile_context>
chip_gen: v7x
topology: tpu7x:2x2x1
jax: 0.10.0
libtpu: 0.0.40
codegen_flags: <defaults>
</compile_context>

<pallas_src>
import jax
import jax.numpy as jnp
from jax import lax
from jax.experimental import pallas as pl
from jax.experimental.pallas import tpu as pltpu


# ---------------- problem sizes (small, consistent with the module) -----------
B = 2        # batch
S = 8        # sequence length (same for x and y; required by V = v(query input))
D = 32       # d_model
H = 4        # num_heads
DH = D // H  # d_head
BS = B * S
BH = B * H
EPS = 1e-12
SCALE = 1.0 / float(DH) ** 0.5
NEG = -1e30  # large finite negative for the additive causal mask

# Packed-weight layout
# Wm (D, 9*D) columns:
#   [0:3D)   self-attn  [Wq | Wk | Wv]   (block-diagonal per head)   \  fused
#   [3D:4D)  cross-attn Wk               (block-diagonal per head)   /  projection
#   [4D:5D)  self-attn  Wo
#   [5D:7D)  cross-attn [Wq | Wv]        (block-diagonal per head)
#   [7D:8D)  cross-attn Wo
#   [8D:9D)  FFN W
# Vb (16, D) rows:
#   0 bq_s, 1 bk_s, 2 bv_s, 3 bo_s, 4 g1, 5 b1,
#   6 bq_c, 7 bv_c, 8 bk_c, 9 bo_c, 10 g2, 11 b2,
#   12 bf, 13 g3, 14 b3, 15 zero-pad


# ------------------------------- kernel ---------------------------------------
def decoder_kernel(xy_ref, w_ref, vb_ref, o_ref):
    xy = xy_ref[...]          # (2*BS, D): rows [0:BS) = x, rows [BS:2BS) = y
    w = w_ref[...]            # (D, 9*D)
    vb = vb_ref[...]          # (16, D)
    x2 = xy[0:BS]             # (BS, D) query stream (for residuals)

    # additive causal mask, built once (0 where allowed, NEG where masked)
    rows = lax.broadcasted_iota(jnp.int32, (S, S), 0)
    cols = lax.broadcasted_iota(jnp.int32, (S, S), 1)
    causal_add = jnp.where(rows >= cols, 0.0, NEG).astype(jnp.float32)   # (S, S)

    def split_heads(z):        # (BS, D) -> (B*H, S, DH)
        return z.reshape(B, S, H, DH).transpose(0, 2, 1, 3).reshape(BH, S, DH)

    def merge_heads(z):        # (B*H, S, DH) -> (BS, D)
        return z.reshape(B, H, S, DH).transpose(0, 2, 1, 3).reshape(BS, D)

    def attention(q, k, v, add_mask):
        # q, k, v: (BS, D); fully batched over (batch x heads), no Python loop.
        qh, kh, vh = split_heads(q), split_heads(k), split_heads(v)
        sc = jnp.einsum('nqd,nkd->nqk', qh, kh,
                        preferred_element_type=jnp.float32) * SCALE      # (B*H,S,S)
        if add_mask is not None:
            sc = sc + add_mask[None, :, :]
        m = jnp.max(sc, axis=-1, keepdims=True)
        p = jnp.exp(sc - m)
        denom = jnp.sum(p, axis=-1, keepdims=True)
        p = p * pl.reciprocal(denom, approx=True)                        # EUP divide
        oh = jnp.einsum('nqk,nkd->nqd', p, vh,
                        preferred_element_type=jnp.float32)              # (B*H,S,DH)
        return merge_heads(oh)                                           # (BS, D)

    def layernorm(z, g, bias):
        # unbiased variance (ddof=1), eps=1e-12 — matches the reference module.
        mean = jnp.mean(z, axis=-1, keepdims=True)
        var = jnp.sum((z - mean) ** 2, axis=-1, keepdims=True) * (1.0 / (D - 1))
        inv = lax.rsqrt(var + EPS)                                       # EUP rsqrt
        return (z - mean) * (g * inv) + bias

    # ---- fused projection: self-attn Q/K/V + cross-attn K in ONE MXU push ----
    proj = jnp.dot(xy, w[:, 0:4 * D], preferred_element_type=jnp.float32)  # (2BS, 4D)
    q_s = proj[0:BS, 0:D] + vb[0:1]
    k_s = proj[0:BS, D:2 * D] + vb[1:2]
    v_s = proj[0:BS, 2 * D:3 * D] + vb[2:3]
    kc = proj[BS:2 * BS, 3 * D:4 * D] + vb[8:9]        # cross-attn K, from y rows

    # ---- self-attention (causal) ----
    a = attention(q_s, k_s, v_s, causal_add)
    a = jnp.dot(a, w[:, 4 * D:5 * D], preferred_element_type=jnp.float32) + vb[3:4]
    h1 = layernorm(x2 + a, vb[4:5], vb[5:6])

    # ---- cross-attention: Q and V from the query stream (reference semantics), K from y ----
    qv = jnp.dot(h1, w[:, 5 * D:7 * D], preferred_element_type=jnp.float32)  # (BS, 2D)
    a = attention(qv[:, 0:D] + vb[6:7], kc, qv[:, D:2 * D] + vb[7:8], None)
    a = jnp.dot(a, w[:, 7 * D:8 * D], preferred_element_type=jnp.float32) + vb[9:10]
    h2 = layernorm(h1 + a, vb[10:11], vb[11:12])

    # ---- FFN ----
    f = jnp.dot(h2, w[:, 8 * D:9 * D], preferred_element_type=jnp.float32) + vb[12:13]
    h3 = layernorm(h2 + f, vb[13:14], vb[14:15])

    o_ref[...] = h3                                     # (BS, D)


# --------------------------- wrapper-side packing ------------------------------
def _block_diag(wh):
    # wh: (H, DH, DH) per-head weights -> (D, D) block-diagonal matrix so that
    # (x @ W_bd)[:, h*DH:(h+1)*DH] == x[:, h*DH:(h+1)*DH] @ wh[h]
    # NOTE(scaling): at realistic D switch these to batched per-head dot_general;
    # at D=32 the MXU is latency-bound and the zero padding is free.
    eye = jnp.eye(H, dtype=wh.dtype)
    return jnp.einsum('hab,hg->hagb', wh, eye).reshape(D, D)


def _pack_params(p):
    def brow(b):  # (H, 1, DH) -> (1, D) concatenated per-head bias
        return b.reshape(1, D)

    wm = jnp.concatenate([
        _block_diag(p["wq_s"]), _block_diag(p["wk_s"]), _block_diag(p["wv_s"]),
        _block_diag(p["wk_c"]),                          # fused with self-attn QKV
        p["wo_s"],
        _block_diag(p["wq_c"]), _block_diag(p["wv_c"]),
        p["wo_c"],
        p["wf"],
    ], axis=1).astype(jnp.float32)                       # (D, 9*D)

    vb = jnp.concatenate([
        brow(p["bq_s"]), brow(p["bk_s"]), brow(p["bv_s"]), p["bo_s"],
        p["g1"], p["b1"],
        brow(p["bq_c"]), brow(p["bv_c"]), brow(p["bk_c"]), p["bo_c"],
        p["g2"], p["b2"],
        p["bf"], p["g3"], p["b3"],
        jnp.zeros((1, D), jnp.float32),
    ], axis=0).astype(jnp.float32)                       # (16, D)
    return wm, vb


def transformers_decoder(x, y, params):
    """x, y: (B, S, D) float32. params: dict of per-head / full weight arrays."""
    # Reference Attention computes V from the query stream, so seq lengths must match.
    assert x.shape == (B, S, D) and y.shape == (B, S, D), "x and y must both be (B, S, D)"

    wm, vb = _pack_params(params)
    # stack query/key streams wrapper-side: one input slab, enables the fused projection
    xy = jnp.concatenate([x.reshape(BS, D), y.reshape(BS, D)], axis=0)   # (2*BS, D)

    vmem_spec = pl.BlockSpec(memory_space=pltpu.MemorySpace.VMEM)
    out = pl.pallas_call(
        decoder_kernel,
        out_shape=jax.ShapeDtypeStruct((BS, D), jnp.float32),
        in_specs=[vmem_spec, vmem_spec, vmem_spec],
        out_specs=vmem_spec,
    )(xy, wm, vb)
    return out.reshape(B, S, D)
    # TODO(synk): if B or S grows, add a batch-parallel grid axis (dimension_semantics)
    # so v7x's second TensorCore is used; at B=2,S=8 per-step overhead would dominate.


# ----------------------------- pure-JAX reference -----------------------------
def _ref_mha(x_in, kv_in, wq, bq, wk, bk, wv, bv, wo, bo, masked):
    outs = []
    scale = 1.0 / jnp.sqrt(jnp.float32(DH))
    for h in range(H):
        xc = x_in[:, h * DH:(h + 1) * DH]
        yc = kv_in[:, h * DH:(h + 1) * DH]
        q = xc @ wq[h] + bq[h]
        k = yc @ wk[h] + bk[h]
        v = xc @ wv[h] + bv[h]          # V from the query stream (reference semantics)
        sc = (q @ k.T) * scale
        if masked:
            rows = jnp.arange(S)[:, None]
            cols = jnp.arange(S)[None, :]
            sc = jnp.where(rows >= cols, sc, -jnp.inf)
        p = jax.nn.softmax(sc, axis=-1)
        outs.append(p @ v)
    return jnp.concatenate(outs, axis=-1) @ wo + bo


def _ref_decoder(x, y, p):
    def ln(z, g, b):
        mean = jnp.mean(z, -1, keepdims=True)
        var = jnp.sum((z - mean) ** 2, -1, keepdims=True) / (D - 1)
        return (z - mean) * g / jnp.sqrt(var + EPS) + b

    outs = []
    for i in range(B):
        xb, yb = x[i], y[i]
        h1 = xb + _ref_mha(xb, xb, p["wq_s"], p["bq_s"], p["wk_s"], p["bk_s"],
                           p["wv_s"], p["bv_s"], p["wo_s"], p["bo_s"], True)
        h1 = ln(h1, p["g1"], p["b1"])
        h2 = h1 + _ref_mha(h1, yb, p["wq_c"], p["bq_c"], p["wk_c"], p["bk_c"],
                           p["wv_c"], p["bv_c"], p["wo_c"], p["bo_c"], False)
        h2 = ln(h2, p["g2"], p["b2"])
        h3 = h2 + (h2 @ p["wf"] + p["bf"])
        h3 = ln(h3, p["g3"], p["b3"])
        outs.append(h3)
    return jnp.stack(outs, axis=0)


# -------------------------------- init & main ----------------------------------
def _init_params(key):
    ks = jax.random.split(key, 32)
    it = iter(ks)

    def nrm(shape, scale=0.1):
        return (scale * jax.random.normal(next(it), shape)).astype(jnp.float32)

    def attn_params():
        return dict(
            wq=nrm((H, DH, DH)), bq=nrm((H, 1, DH), 0.01),
            wk=nrm((H, DH, DH)), bk=nrm((H, 1, DH), 0.01),
            wv=nrm((H, DH, DH)), bv=nrm((H, 1, DH), 0.01),
            wo=nrm((D, D)), bo=nrm((1, D), 0.01),
        )

    sa = attn_params()
    ca = attn_params()
    p = {
        "wq_s": sa["wq"], "bq_s": sa["bq"], "wk_s": sa["wk"], "bk_s": sa["bk"],
        "wv_s": sa["wv"], "bv_s": sa["bv"], "wo_s": sa["wo"], "bo_s": sa["bo"],
        "g1": jnp.ones((1, D), jnp.float32), "b1": jnp.zeros((1, D), jnp.float32),
        "wq_c": ca["wq"], "bq_c": ca["bq"], "wk_c": ca["wk"], "bk_c": ca["bk"],
        "wv_c": ca["wv"], "bv_c": ca["bv"], "wo_c": ca["wo"], "bo_c": ca["bo"],
        "g2": jnp.ones((1, D), jnp.float32), "b2": jnp.zeros((1, D), jnp.float32),
        "wf": nrm((D, D)), "bf": nrm((1, D), 0.01),
        "g3": jnp.ones((1, D), jnp.float32), "b3": jnp.zeros((1, D), jnp.float32),
    }
    return p


if __name__ == "__main__":
    key = jax.random.PRNGKey(0)
    kx, ky, kp = jax.random.split(key, 3)
    x = jax.random.normal(kx, (B, S, D), dtype=jnp.float32)
    y = jax.random.normal(ky, (B, S, D), dtype=jnp.float32)
    params = _init_params(kp)

    out = transformers_decoder(x, y, params)
    out = jax.block_until_ready(out)

    ref = _ref_decoder(x, y, params)
    assert out.shape == (B, S, D)
    assert jnp.allclose(out, ref, rtol=2e-3, atol=2e-3), "mismatch vs pure-JAX reference"

    print("KERNEL_OK")
</pallas_src>

<mosaic_0001>
module attributes {stable_mosaic.version = 11 : i64} {
  func.func @decoder_kernel(%arg0: memref<32x32xf32, #tpu.memory_space<vmem>>, %arg1: memref<32x288xf32, #tpu.memory_space<vmem>>, %arg2: memref<16x32xf32, #tpu.memory_space<vmem>>, %arg3: memref<16x32xf32, #tpu.memory_space<vmem>>) attributes {dimension_semantics = [], scalar_prefetch = 0 : i64, scratch_operands = 0 : i64, tpu.core_type = #tpu.core_type<tc>} {
    %c0 = arith.constant 0 : index
    %c0_0 = arith.constant 0 : index
    %0 = vector.load %arg0[%c0, %c0_0] : memref<32x32xf32, #tpu.memory_space<vmem>>, vector<32x32xf32>
    %c0_1 = arith.constant 0 : index
    %c0_2 = arith.constant 0 : index
    %1 = vector.load %arg1[%c0_1, %c0_2] : memref<32x288xf32, #tpu.memory_space<vmem>>, vector<32x288xf32>
    %c0_3 = arith.constant 0 : index
    %c0_4 = arith.constant 0 : index
    %2 = vector.load %arg2[%c0_3, %c0_4] : memref<16x32xf32, #tpu.memory_space<vmem>>, vector<16x32xf32>
    %3 = vector.extract_strided_slice %0 {offsets = [0, 0], sizes = [16, 32], strides = [1, 1]} : vector<32x32xf32> to vector<16x32xf32>
    %4 = tpu.iota {dimensions = array<i32: 0>} : vector<8x8xi32>
    %5 = tpu.iota {dimensions = array<i32: 1>} : vector<8x8xi32>
    %6 = arith.cmpi sge, %4, %5 : vector<8x8xi32>
    %cst = arith.constant 0.000000e+00 : f32
    %cst_5 = arith.constant -1.000000e+30 : f32
    %7 = vector.broadcast %cst : f32 to vector<8x8xf32>
    %8 = vector.broadcast %cst_5 : f32 to vector<8x8xf32>
    %9 = arith.select %6, %7, %8 : vector<8x8xi1>, vector<8x8xf32>
    %10 = vector.extract_strided_slice %1 {offsets = [0, 0], sizes = [32, 128], strides = [1, 1]} : vector<32x288xf32> to vector<32x128xf32>
    %cst_6 = arith.constant dense<0.000000e+00> : vector<32x128xf32>
    %11 = tpu.matmul %0, %10, %cst_6 {dimension_numbers = #tpu.dot_dimension_numbers<[1], [0], [0], [1], [0, 0, 1, 1], [], []>} : vector<32x32xf32>, vector<32x128xf32>, vector<32x128xf32> -> vector<32x128xf32>
    %12 = vector.extract_strided_slice %11 {offsets = [0, 0], sizes = [16, 32], strides = [1, 1]} : vector<32x128xf32> to vector<16x32xf32>
    %13 = vector.extract_strided_slice %2 {offsets = [0, 0], sizes = [1, 32], strides = [1, 1]} : vector<16x32xf32> to vector<1x32xf32>
    %14 = vector.broadcast %13 : vector<1x32xf32> to vector<16x32xf32>
    %15 = arith.addf %12, %14 : vector<16x32xf32>
    %16 = vector.extract_strided_slice %11 {offsets = [0, 32], sizes = [16, 32], strides = [1, 1]} : vector<32x128xf32> to vector<16x32xf32>
    %17 = vector.extract_strided_slice %2 {offsets = [1, 0], sizes = [1, 32], strides = [1, 1]} : vector<16x32xf32> to vector<1x32xf32>
    %18 = vector.broadcast %17 : vector<1x32xf32> to vector<16x32xf32>
    %19 = arith.addf %16, %18 : vector<16x32xf32>
    %20 = vector.extract_strided_slice %11 {offsets = [0, 64], sizes = [16, 32], strides = [1, 1]} : vector<32x128xf32> to vector<16x32xf32>
    %21 = vector.extract_strided_slice %2 {offsets = [2, 0], sizes = [1, 32], strides = [1, 1]} : vector<16x32xf32> to vector<1x32xf32>
    %22 = vector.broadcast %21 : vector<1x32xf32> to vector<16x32xf32>
    %23 = arith.addf %20, %22 : vector<16x32xf32>
    %24 = vector.extract_strided_slice %11 {offsets = [16, 96], sizes = [16, 32], strides = [1, 1]} : vector<32x128xf32> to vector<16x32xf32>
    %25 = vector.extract_strided_slice %2 {offsets = [8, 0], sizes = [1, 32], strides = [1, 1]} : vector<16x32xf32> to vector<1x32xf32>
    %26 = vector.broadcast %25 : vector<1x32xf32> to vector<16x32xf32>
    %27 = arith.addf %24, %26 : vector<16x32xf32>
    %28 = vector.shape_cast %15 : vector<16x32xf32> to vector<2x8x4x8xf32>
    %29 = tpu.transpose %28, [0, 2, 1, 3] : vector<2x8x4x8xf32> -> vector<2x4x8x8xf32>
    %30 = vector.shape_cast %29 : vector<2x4x8x8xf32> to vector<8x8x8xf32>
    %31 = vector.shape_cast %19 : vector<16x32xf32> to vector<2x8x4x8xf32>
    %32 = tpu.transpose %31, [0, 2, 1, 3] : vector<2x8x4x8xf32> -> vector<2x4x8x8xf32>
    %33 = vector.shape_cast %32 : vector<2x4x8x8xf32> to vector<8x8x8xf32>
    %34 = vector.shape_cast %23 : vector<16x32xf32> to vector<2x8x4x8xf32>
    %35 = tpu.transpose %34, [0, 2, 1, 3] : vector<2x8x4x8xf32> -> vector<2x4x8x8xf32>
    %36 = vector.shape_cast %35 : vector<2x4x8x8xf32> to vector<8x8x8xf32>
    "tpu.trace_start"() <{level = 10 : i32, message = "nqd,nkd->nqk"}> : () -> ()
    %cst_7 = arith.constant dense<0.000000e+00> : vector<8x8x8xf32>
    %37 = tpu.matmul %30, %33, %cst_7 {dimension_numbers = #tpu.dot_dimension_numbers<[2], [2], [1], [1], [0, 0, 0, 1, 1, 1], [0], [0]>} : vector<8x8x8xf32>, vector<8x8x8xf32>, vector<8x8x8xf32> -> vector<8x8x8xf32>
    "tpu.trace_stop"() : () -> ()
    %cst_8 = arith.constant 0.353553385 : f32
    %38 = vector.broadcast %cst_8 : f32 to vector<8x8x8xf32>
    %39 = arith.mulf %37, %38 : vector<8x8x8xf32>
    %40 = vector.shape_cast %9 : vector<8x8xf32> to vector<1x8x8xf32>
    %41 = vector.broadcast %40 : vector<1x8x8xf32> to vector<8x8x8xf32>
    %42 = arith.addf %39, %41 : vector<8x8x8xf32>
    %cst_9 = arith.constant dense<0xFF800000> : vector<8x8xf32>
    %43 = vector.multi_reduction <maximumf>, %42, %cst_9 [2] : vector<8x8x8xf32> to vector<8x8xf32>
    %44 = vector.shape_cast %43 : vector<8x8xf32> to vector<8x8x1xf32>
    %45 = vector.broadcast %44 : vector<8x8x1xf32> to vector<8x8x8xf32>
    %46 = arith.subf %42, %45 : vector<8x8x8xf32>
    %47 = math.exp %46 : vector<8x8x8xf32>
    %cst_10 = arith.constant dense<0.000000e+00> : vector<8x8xf32>
    %48 = vector.multi_reduction <add>, %47, %cst_10 [2] : vector<8x8x8xf32> to vector<8x8xf32>
    %49 = vector.shape_cast %48 : vector<8x8xf32> to vector<8x8x1xf32>
    %50 = tpu.reciprocal %49 {approx = true} : vector<8x8x1xf32> -> vector<8x8x1xf32>
    %51 = vector.broadcast %50 : vector<8x8x1xf32> to vector<8x8x8xf32>
    %52 = arith.mulf %47, %51 : vector<8x8x8xf32>
    "tpu.trace_start"() <{level = 10 : i32, message = "nqk,nkd->nqd"}> : () -> ()
    %cst_11 = arith.constant dense<0.000000e+00> : vector<8x8x8xf32>
    %53 = tpu.matmul %52, %36, %cst_11 {dimension_numbers = #tpu.dot_dimension_numbers<[2], [1], [1], [2], [0, 0, 0, 1, 1, 2], [0], [0]>} : vector<8x8x8xf32>, vector<8x8x8xf32>, vector<8x8x8xf32> -> vector<8x8x8xf32>
    "tpu.trace_stop"() : () -> ()
    %54 = vector.shape_cast %53 : vector<8x8x8xf32> to vector<2x4x8x8xf32>
    %55 = tpu.transpose %54, [0, 2, 1, 3] : vector<2x4x8x8xf32> -> vector<2x8x4x8xf32>
    %56 = vector.shape_cast %55 : vector<2x8x4x8xf32> to vector<16x32xf32>
    %57 = vector.extract_strided_slice %1 {offsets = [0, 128], sizes = [32, 32], strides = [1, 1]} : vector<32x288xf32> to vector<32x32xf32>
    %cst_12 = arith.constant dense<0.000000e+00> : vector<16x32xf32>
    %58 = tpu.matmul %56, %57, %cst_12 {dimension_numbers = #tpu.dot_dimension_numbers<[1], [0], [0], [1], [0, 0, 1, 1], [], []>} : vector<16x32xf32>, vector<32x32xf32>, vector<16x32xf32> -> vector<16x32xf32>
    %59 = vector.extract_strided_slice %2 {offsets = [3, 0], sizes = [1, 32], strides = [1, 1]} : vector<16x32xf32> to vector<1x32xf32>
    %60 = vector.broadcast %59 : vector<1x32xf32> to vector<16x32xf32>
    %61 = arith.addf %58, %60 : vector<16x32xf32>
    %62 = arith.addf %3, %61 : vector<16x32xf32>
    %63 = vector.extract_strided_slice %2 {offsets = [4, 0], sizes = [1, 32], strides = [1, 1]} : vector<16x32xf32> to vector<1x32xf32>
    %64 = vector.extract_strided_slice %2 {offsets = [5, 0], sizes = [1, 32], strides = [1, 1]} : vector<16x32xf32> to vector<1x32xf32>
    %cst_13 = arith.constant dense<0.000000e+00> : vector<16xf32>
    %65 = vector.multi_reduction <add>, %62, %cst_13 [1] : vector<16x32xf32> to vector<16xf32>
    %66 = vector.shape_cast %65 : vector<16xf32> to vector<16x1xf32>
    %cst_14 = arith.constant 3.200000e+01 : f32
    %67 = vector.broadcast %cst_14 : f32 to vector<16x1xf32>
    %68 = arith.divf %66, %67 : vector<16x1xf32>
    %69 = vector.broadcast %68 : vector<16x1xf32> to vector<16x32xf32>
    %70 = arith.subf %62, %69 : vector<16x32xf32>
    %71 = arith.mulf %70, %70 : vector<16x32xf32>
    %cst_15 = arith.constant dense<0.000000e+00> : vector<16xf32>
    %72 = vector.multi_reduction <add>, %71, %cst_15 [1] : vector<16x32xf32> to vector<16xf32>
    %73 = vector.shape_cast %72 : vector<16xf32> to vector<16x1xf32>
    %cst_16 = arith.constant 0.0322580636 : f32
    %74 = vector.broadcast %cst_16 : f32 to vector<16x1xf32>
    %75 = arith.mulf %73, %74 : vector<16x1xf32>
    %cst_17 = arith.constant 9.99999996E-13 : f32
    %76 = vector.broadcast %cst_17 : f32 to vector<16x1xf32>
    %77 = arith.addf %75, %76 : vector<16x1xf32>
    %78 = math.rsqrt %77 : vector<16x1xf32>
    %79 = vector.broadcast %68 : vector<16x1xf32> to vector<16x32xf32>
    %80 = arith.subf %62, %79 : vector<16x32xf32>
    %81 = vector.broadcast %63 : vector<1x32xf32> to vector<16x32xf32>
    %82 = vector.broadcast %78 : vector<16x1xf32> to vector<16x32xf32>
    %83 = arith.mulf %81, %82 : vector<16x32xf32>
    %84 = arith.mulf %80, %83 : vector<16x32xf32>
    %85 = vector.broadcast %64 : vector<1x32xf32> to vector<16x32xf32>
    %86 = arith.addf %84, %85 : vector<16x32xf32>
    %87 = vector.extract_strided_slice %1 {offsets = [0, 160], sizes = [32, 64], strides = [1, 1]} : vector<32x288xf32> to vector<32x64xf32>
    %cst_18 = arith.constant dense<0.000000e+00> : vector<16x64xf32>
    %88 = tpu.matmul %86, %87, %cst_18 {dimension_numbers = #tpu.dot_dimension_numbers<[1], [0], [0], [1], [0, 0, 1, 1], [], []>} : vector<16x32xf32>, vector<32x64xf32>, vector<16x64xf32> -> vector<16x64xf32>
    %89 = vector.extract_strided_slice %88 {offsets = [0, 0], sizes = [16, 32], strides = [1, 1]} : vector<16x64xf32> to vector<16x32xf32>
    %90 = vector.extract_strided_slice %2 {offsets = [6, 0], sizes = [1, 32], strides = [1, 1]} : vector<16x32xf32> to vector<1x32xf32>
    %91 = vector.broadcast %90 : vector<1x32xf32> to vector<16x32xf32>
    %92 = arith.addf %89, %91 : vector<16x32xf32>
    %93 = vector.extract_strided_slice %88 {offsets = [0, 32], sizes = [16, 32], strides = [1, 1]} : vector<16x64xf32> to vector<16x32xf32>
    %94 = vector.extract_strided_slice %2 {offsets = [7, 0], sizes = [1, 32], strides = [1, 1]} : vector<16x32xf32> to vector<1x32xf32>
    %95 = vector.broadcast %94 : vector<1x32xf32> to vector<16x32xf32>
    %96 = arith.addf %93, %95 : vector<16x32xf32>
    %97 = vector.shape_cast %92 : vector<16x32xf32> to vector<2x8x4x8xf32>
    %98 = tpu.transpose %97, [0, 2, 1, 3] : vector<2x8x4x8xf32> -> vector<2x4x8x8xf32>
    %99 = vector.shape_cast %98 : vector<2x4x8x8xf32> to vector<8x8x8xf32>
    %100 = vector.shape_cast %27 : vector<16x32xf32> to vector<2x8x4x8xf32>
    %101 = tpu.transpose %100, [0, 2, 1, 3] : vector<2x8x4x8xf32> -> vector<2x4x8x8xf32>
    %102 = vector.shape_cast %101 : vector<2x4x8x8xf32> to vector<8x8x8xf32>
    %103 = vector.shape_cast %96 : vector<16x32xf32> to vector<2x8x4x8xf32>
    %104 = tpu.transpose %103, [0, 2, 1, 3] : vector<2x8x4x8xf32> -> vector<2x4x8x8xf32>
    %105 = vector.shape_cast %104 : vector<2x4x8x8xf32> to vector<8x8x8xf32>
    "tpu.trace_start"() <{level = 10 : i32, message = "nqd,nkd->nqk"}> : () -> ()
    %cst_19 = arith.constant dense<0.000000e+00> : vector<8x8x8xf32>
    %106 = tpu.matmul %99, %102, %cst_19 {dimension_numbers = #tpu.dot_dimension_numbers<[2], [2], [1], [1], [0, 0, 0, 1, 1, 1], [0], [0]>} : vector<8x8x8xf32>, vector<8x8x8xf32>, vector<8x8x8xf32> -> vector<8x8x8xf32>
    "tpu.trace_stop"() : () -> ()
    %cst_20 = arith.constant 0.353553385 : f32
    %107 = vector.broadcast %cst_20 : f32 to vector<8x8x8xf32>
    %108 = arith.mulf %106, %107 : vector<8x8x8xf32>
    %cst_21 = arith.constant dense<0xFF800000> : vector<8x8xf32>
    %109 = vector.multi_reduction <maximumf>, %108, %cst_21 [2] : vector<8x8x8xf32> to vector<8x8xf32>
    %110 = vector.shape_cast %109 : vector<8x8xf32> to vector<8x8x1xf32>
    %111 = vector.broadcast %110 : vector<8x8x1xf32> to vector<8x8x8xf32>
    %112 = arith.subf %108, %111 : vector<8x8x8xf32>
    %113 = math.exp %112 : vector<8x8x8xf32>
    %cst_22 = arith.constant dense<0.000000e+00> : vector<8x8xf32>
    %114 = vector.multi_reduction <add>, %113, %cst_22 [2] : vector<8x8x8xf32> to vector<8x8xf32>
    %115 = vector.shape_cast %114 : vector<8x8xf32> to vector<8x8x1xf32>
    %116 = tpu.reciprocal %115 {approx = true} : vector<8x8x1xf32> -> vector<8x8x1xf32>
    %117 = vector.broadcast %116 : vector<8x8x1xf32> to vector<8x8x8xf32>
    %118 = arith.mulf %113, %117 : vector<8x8x8xf32>
    "tpu.trace_start"() <{level = 10 : i32, message = "nqk,nkd->nqd"}> : () -> ()
    %cst_23 = arith.constant dense<0.000000e+00> : vector<8x8x8xf32>
    %119 = tpu.matmul %118, %105, %cst_23 {dimension_numbers = #tpu.dot_dimension_numbers<[2], [1], [1], [2], [0, 0, 0, 1, 1, 2], [0], [0]>} : vector<8x8x8xf32>, vector<8x8x8xf32>, vector<8x8x8xf32> -> vector<8x8x8xf32>
    "tpu.trace_stop"() : () -> ()
    %120 = vector.shape_cast %119 : vector<8x8x8xf32> to vector<2x4x8x8xf32>
    %121 = tpu.transpose %120, [0, 2, 1, 3] : vector<2x4x8x8xf32> -> vector<2x8x4x8xf32>
    %122 = vector.shape_cast %121 : vector<2x8x4x8xf32> to vector<16x32xf32>
    %123 = vector.extract_strided_slice %1 {offsets = [0, 224], sizes = [32, 32], strides = [1, 1]} : vector<32x288xf32> to vector<32x32xf32>
    %cst_24 = arith.constant dense<0.000000e+00> : vector<16x32xf32>
    %124 = tpu.matmul %122, %123, %cst_24 {dimension_numbers = #tpu.dot_dimension_numbers<[1], [0], [0], [1], [0, 0, 1, 1], [], []>} : vector<16x32xf32>, vector<32x32xf32>, vector<16x32xf32> -> vector<16x32xf32>
    %125 = vector.extract_strided_slice %2 {offsets = [9, 0], sizes = [1, 32], strides = [1, 1]} : vector<16x32xf32> to vector<1x32xf32>
    %126 = vector.broadcast %125 : vector<1x32xf32> to vector<16x32xf32>
    %127 = arith.addf %124, %126 : vector<16x32xf32>
    %128 = arith.addf %86, %127 : vector<16x32xf32>
    %129 = vector.extract_strided_slice %2 {offsets = [10, 0], sizes = [1, 32], strides = [1, 1]} : vector<16x32xf32> to vector<1x32xf32>
    %130 = vector.extract_strided_slice %2 {offsets = [11, 0], sizes = [1, 32], strides = [1, 1]} : vector<16x32xf32> to vector<1x32xf32>
    %cst_25 = arith.constant dense<0.000000e+00> : vector<16xf32>
    %131 = vector.multi_reduction <add>, %128, %cst_25 [1] : vector<16x32xf32> to vector<16xf32>
    %132 = vector.shape_cast %131 : vector<16xf32> to vector<16x1xf32>
    %cst_26 = arith.constant 3.200000e+01 : f32
    %133 = vector.broadcast %cst_26 : f32 to vector<16x1xf32>
    %134 = arith.divf %132, %133 : vector<16x1xf32>
    %135 = vector.broadcast %134 : vector<16x1xf32> to vector<16x32xf32>
    %136 = arith.subf %128, %135 : vector<16x32xf32>
    %137 = arith.mulf %136, %136 : vector<16x32xf32>
    %cst_27 = arith.constant dense<0.000000e+00> : vector<16xf32>
    %138 = vector.multi_reduction <add>, %137, %cst_27 [1] : vector<16x32xf32> to vector<16xf32>
    %139 = vector.shape_cast %138 : vector<16xf32> to vector<16x1xf32>
    %cst_28 = arith.constant 0.0322580636 : f32
    %140 = vector.broadcast %cst_28 : f32 to vector<16x1xf32>
    %141 = arith.mulf %139, %140 : vector<16x1xf32>
    %cst_29 = arith.constant 9.99999996E-13 : f32
    %142 = vector.broadcast %cst_29 : f32 to vector<16x1xf32>
    %143 = arith.addf %141, %142 : vector<16x1xf32>
    %144 = math.rsqrt %143 : vector<16x1xf32>
    %145 = vector.broadcast %134 : vector<16x1xf32> to vector<16x32xf32>
    %146 = arith.subf %128, %145 : vector<16x32xf32>
    %147 = vector.broadcast %129 : vector<1x32xf32> to vector<16x32xf32>
    %148 = vector.broadcast %144 : vector<16x1xf32> to vector<16x32xf32>
    %149 = arith.mulf %147, %148 : vector<16x32xf32>
    %150 = arith.mulf %146, %149 : vector<16x32xf32>
    %151 = vector.broadcast %130 : vector<1x32xf32> to vector<16x32xf32>
    %152 = arith.addf %150, %151 : vector<16x32xf32>
    %153 = vector.extract_strided_slice %1 {offsets = [0, 256], sizes = [32, 32], strides = [1, 1]} : vector<32x288xf32> to vector<32x32xf32>
    %cst_30 = arith.constant dense<0.000000e+00> : vector<16x32xf32>
    %154 = tpu.matmul %152, %153, %cst_30 {dimension_numbers = #tpu.dot_dimension_numbers<[1], [0], [0], [1], [0, 0, 1, 1], [], []>} : vector<16x32xf32>, vector<32x32xf32>, vector<16x32xf32> -> vector<16x32xf32>
    %155 = vector.extract_strided_slice %2 {offsets = [12, 0], sizes = [1, 32], strides = [1, 1]} : vector<16x32xf32> to vector<1x32xf32>
    %156 = vector.broadcast %155 : vector<1x32xf32> to vector<16x32xf32>
    %157 = arith.addf %154, %156 : vector<16x32xf32>
    %158 = arith.addf %152, %157 : vector<16x32xf32>
    %159 = vector.extract_strided_slice %2 {offsets = [13, 0], sizes = [1, 32], strides = [1, 1]} : vector<16x32xf32> to vector<1x32xf32>
    %160 = vector.extract_strided_slice %2 {offsets = [14, 0], sizes = [1, 32], strides = [1, 1]} : vector<16x32xf32> to vector<1x32xf32>
    %cst_31 = arith.constant dense<0.000000e+00> : vector<16xf32>
    %161 = vector.multi_reduction <add>, %158, %cst_31 [1] : vector<16x32xf32> to vector<16xf32>
    %162 = vector.shape_cast %161 : vector<16xf32> to vector<16x1xf32>
    %cst_32 = arith.constant 3.200000e+01 : f32
    %163 = vector.broadcast %cst_32 : f32 to vector<16x1xf32>
    %164 = arith.divf %162, %163 : vector<16x1xf32>
    %165 = vector.broadcast %164 : vector<16x1xf32> to vector<16x32xf32>
    %166 = arith.subf %158, %165 : vector<16x32xf32>
    %167 = arith.mulf %166, %166 : vector<16x32xf32>
    %cst_33 = arith.constant dense<0.000000e+00> : vector<16xf32>
    %168 = vector.multi_reduction <add>, %167, %cst_33 [1] : vector<16x32xf32> to vector<16xf32>
    %169 = vector.shape_cast %168 : vector<16xf32> to vector<16x1xf32>
    %cst_34 = arith.constant 0.0322580636 : f32
    %170 = vector.broadcast %cst_34 : f32 to vector<16x1xf32>
    %171 = arith.mulf %169, %170 : vector<16x1xf32>
    %cst_35 = arith.constant 9.99999996E-13 : f32
    %172 = vector.broadcast %cst_35 : f32 to vector<16x1xf32>
    %173 = arith.addf %171, %172 : vector<16x1xf32>
    %174 = math.rsqrt %173 : vector<16x1xf32>
    %175 = vector.broadcast %164 : vector<16x1xf32> to vector<16x32xf32>
    %176 = arith.subf %158, %175 : vector<16x32xf32>
    %177 = vector.broadcast %159 : vector<1x32xf32> to vector<16x32xf32>
    %178 = vector.broadcast %174 : vector<16x1xf32> to vector<16x32xf32>
    %179 = arith.mulf %177, %178 : vector<16x32xf32>
    %180 = arith.mulf %176, %179 : vector<16x32xf32>
    %181 = vector.broadcast %160 : vector<1x32xf32> to vector<16x32xf32>
    %182 = arith.addf %180, %181 : vector<16x32xf32>
    %c0_36 = arith.constant 0 : index
    %c0_37 = arith.constant 0 : index
    %183 = vector.load %arg3[%c0_36, %c0_37] : memref<16x32xf32, #tpu.memory_space<vmem>>, vector<16x32xf32>
    tpu.vector_store %arg3[%c0_36, %c0_37], %182 {strides = array<i32>} : memref<16x32xf32, #tpu.memory_space<vmem>>, vector<16x32xf32>,
    return
  }
}

</mosaic_0001>

<bundles_post_ra>
// kernel: tpu_custom_call.1
= control target key start
LH: loop header
LB: loop body
LE: loop exit
PB: predicated region body
PF: predicated region fallthrough
CT: control target
= control target key end

     0   :  { %8 = vsyncpa [#allocation3], 0  ;;  %s7395_s0 = inlined_call_operand.hbm [shape: f32[32,32], index: 0, kind: input, shape index: {}]   ;;  %s7396_s1 = inlined_call_operand.hbm [shape: f32[32,288], index: 1, kind: input, shape index: {}]   ;;  %s7397_s2 = inlined_call_operand.hbm [shape: f32[16,32], index: 2, kind: input, shape index: {}]   ;;  %s7398_s3 = inlined_call_operand.hbm [shape: f32[16,32], index: 3, kind: output, shape index: {}]  }
   0x1   :  { %9 = vsyncpa [#allocation6], 0 }
   0x2   :  { %10 = vsyncpa [#allocation4], 0  ;;  %s6414_s12 = smov [#allocation5]   ;;  %s6320_s16 = scalar_lea.hbm %s7396_s1, 1536 }
   0x3   :  { %s28_s13 = sshll.u32 %s6414_s12, 4  ;;  %p6321_p0 = scmp.ne.s32.totalorder %s7396_s1, %s6320_s16  ;;  %s29_s13 = int_to_ptr.vmem [resolvable:$true] %s28_s13 }
   0x4   :  { %p6324_p1 = scmp.lt.u32.totalorder %s6320_s16, %s7396_s1 }
   0x6   :  { %p6326_p2 = pnand %p6324_p1, %p6321_p0 }
   0x8   :  { %6329 = shalt.err (!%p6326_p2)
}
   0x9   :  { %s6330_s21 = scalar_lea.vmem %s29_s13, 1536  ;;  %p6335_p4 = scmp.lt.s32.totalorder %s29_s13, %s29_s13 }
   0xa   :  { %p6331_p3 = scmp.ne.s32.totalorder %s29_s13, %s6330_s21  ;;  %p6336_p5 = scmp.lt.s32.totalorder %s6330_s21, %s6330_s21 }
   0xc   :  { %p6337_p6 = por %p6336_p5, %p6335_p4 }
   0xe   :  { %p6338_p7 = pnand %p6337_p6, %p6331_p3 }
  0x10   :  { %6341 = shalt.err (!%p6338_p7)
}
  0x11   :  { %s6415_s22 = smov 384   ;;  %s6416_s23 = smov 24  }
  0x12   :  { %34 = dma.hbm_to_vmem [thread:$0]  %s7396_s1, 1536, %s29_s13, [#allocation6], %s6415_s22, %s6415_s22, %s6416_s23  }
  0x13   :  { %s6417_s26 = smov [#allocation2]   ;;  %s6342_s30 = scalar_lea.hbm %s7395_s0, 512 }
  0x14   :  { %s16_s27 = sshll.u32 %s6417_s26, 4  ;;  %p6343_p8 = scmp.ne.s32.totalorder %s7395_s0, %s6342_s30  ;;  %s17_s27 = int_to_ptr.vmem [resolvable:$true] %s16_s27 }
  0x15   :  { %p6346_p9 = scmp.lt.u32.totalorder %s6342_s30, %s7395_s0 }
  0x17   :  { %p6348_p10 = pnand %p6346_p9, %p6343_p8 }
  0x19   :  { %6351 = shalt.err (!%p6348_p10)
}
  0x1a   :  { %s6352_s8 = scalar_lea.vmem %s17_s27, 512  ;;  %p6357_p12 = scmp.lt.s32.totalorder %s17_s27, %s17_s27 }
  0x1b   :  { %p6353_p11 = scmp.ne.s32.totalorder %s17_s27, %s6352_s8  ;;  %p6358_p13 = scmp.lt.s32.totalorder %s6352_s8, %s6352_s8 }
  0x1d   :  { %p6359_p0 = por %p6358_p13, %p6357_p12 }
  0x1f   :  { %p6360_p1 = pnand %p6359_p0, %p6353_p11 }
  0x21   :  { %6363 = shalt.err (!%p6360_p1)
}
  0x22   :  { %s6418_s1 = smov 128   ;;  %s6419_s9 = smov 8  }
  0x23   :  { %22 = dma.hbm_to_vmem [thread:$0]  %s7395_s0, 512, %s17_s27, [#allocation3], %s6418_s1, %s6418_s1, %s6419_s9  }
  0x24   :  { %s6420_s12 = smov [#allocation7]   ;;  %s6364_s16 = scalar_lea.hbm %s7397_s2, 256 }
  0x25   :  { %s40_s13 = sshll.u32 %s6420_s12, 4  ;;  %p6365_p2 = scmp.ne.s32.totalorder %s7397_s2, %s6364_s16  ;;  %s41_s13 = int_to_ptr.vmem [resolvable:$true] %s40_s13 }
  0x26   :  { %p6368_p3 = scmp.lt.u32.totalorder %s6364_s16, %s7397_s2 }
  0x28   :  { %p6370_p4 = pnand %p6368_p3, %p6365_p2 }
  0x2a   :  { %6373 = shalt.err (!%p6370_p4)
}
  0x2b   :  { %s6374_s21 = scalar_lea.vmem %s41_s13, 256  ;;  %p6379_p6 = scmp.lt.s32.totalorder %s41_s13, %s41_s13 }
  0x2c   :  { %p6375_p5 = scmp.ne.s32.totalorder %s41_s13, %s6374_s21  ;;  %p6380_p7 = scmp.lt.s32.totalorder %s6374_s21, %s6374_s21 }
  0x2e   :  { %p6381_p8 = por %p6380_p7, %p6379_p6 }
  0x30   :  { %p6382_p9 = pnand %p6381_p8, %p6375_p5 }
  0x32   :  { %6385 = shalt.err (!%p6382_p9)
}
  0x33   :  { %46 = dma.hbm_to_vmem [thread:$0]  %s7397_s2, 256, %s41_s13, [#allocation6], %s6418_s1, %s6418_s1, %s6419_s9  }
  0x34   :  { %6408 = dma.done.wait [#allocation3], 512  }
  0x35   :  { %6409 = vsyncadd [#allocation3], 4294966784 }
  0x36   :  { %6410 = dma.done.wait [#allocation6], 1792  }
  0x37   :  { %6411 = vsyncadd [#allocation6], 4294965504  ;;  %v74_v0 = vlaneseq  ;;  %vm80_vm0 = vcmask 261120   ;;  %v60_v3 = vld [vmem:[#allocation5] sm:$0xff]  ;;  %v63_v4 = vld [vmem:[#allocation5 + $0x18] sm:$0xff]  ;;  %s6421_s2 = smov 32  }
  0x38   :  { %v66_v5 = vld [vmem:[#allocation5 + $0x30] sm:$0xff]  ;;  %v6156_v6 = vpack.c.bf16 %v63_v4, %v60_v3  ;;  %v69_v7 = vld [vmem:[#allocation5 + $0x48] sm:$0xff]  ;;  %v56_v8 = vld [vmem:[#allocation2] sm:$0xff]  ;;  %s6422_s24 = smov 112   ;;  %s6423_s25 = smov 120   ;;  %v6426_v28 = vmov 0.0  }
  0x39   :  { %v6498_v1 = vshrl.u32 %v74_v0, 7  ;;  %v6160_v9 = vpack.c.bf16 %v69_v7, %v66_v5  ;;  %5946 = vmatprep.mubr.msk.f32.mxu0 %vm80_vm0, %v56_v8  ;;  %v72_v10 = vld [vmem:[#allocation7] sm:$0xff]  ;;  %v57_v12 = vld [vmem:[#allocation2 + $0x8] sm:$0xff]  ;;  %s6424_s26 = smov 104   ;;  %s6425_s27 = smov 96   ;;  %v58_v26 = vld [vmem:[#allocation2 + $0x10] sm:$0xff]  ;;  %5952 = vmatprep.subr.mxu1 %v6426_v28 }
  0x3a   :  { %6157 = vmatprep.subr.bf16.mxu0 %v6156_v6  ;;  %v59_v27 = vld [vmem:[#allocation2 + $0x18] sm:$0xff]  ;;  %s6427_s28 = smov 64   ;;  %vm6428_vm1 = vmmov 0   ;;  %v6429_v34 = vmov 1983009808   ;;  %vm1126_vm2 = vcmask 64512  }
  0x3b   :  { %v186_v2 = vsub.s32 1, %v6498_v1  ;;  %6159 = vmatpush3.bf16.msra.mxu0 %v6156_v6  ;;  %v180_v13 = vsub.s32 0, %v6498_v1  ;;  %v196_v31 = vsub.s32 2, %v6498_v1  ;;  %5954 = vmatprep.mubr.msk.f32.mxu1 %vm6428_vm1, %v6426_v28  ;;  %v237_v35 = vunpack.c.l.s4 %v6429_v34  ;;  %s6432_s29 = smov 16  }
  0x3c   :  { %6161 = vmatprep.subr.bf16.mxu0 %v6160_v9  ;;  %v6430_v38 = vmov 1934713408   ;;  %vm2721_vm4 = vcmask 130048   ;;  %vm2724_vm5 = vcmask 195584  }
  0x3d   :  { %v187_v11 = vrot.slane %v72_v10, %v186_v2  ;;  %v181_v14 = vrot.slane %v72_v10, %v180_v13  ;;  %v197_v32 = vrot.slane %v72_v10, %v196_v31  ;;  %v269_v39 = vunpack.c.l.s4 %v6430_v38 }
  0x3e   :  { %v238_v40 = vunpack.c.0.s8 %v237_v35 }
  0x3f   :  { %189 = vrot.lane.b32.xlu0 %v187_v11, %s6421_s2  ;;  %6163 = vmatpush3.bf16.msra.mxu0 %v6160_v9  ;;  %v270_v43 = vunpack.c.0.s8 %v269_v39 }
  0x40   :  { %5967 = vmatprep.subr.mxu0 %v6426_v28  ;;  %v6560_v46 = vsub.s32 %v238_v40, %v6498_v1 }
  0x41   :  { %v6565_v55 = vsub.s32 %v270_v43, %v6498_v1 }
  0x42   :  { %5947 = vmatmul.mubr.msk.f32.vlgmr.msra.gmra.mrb[0].mxu0 %vm80_vm0, %v57_v12 }
  0x43   :  { %5949 = vmatprep.mubr.msk.f32.mxu0 %vm80_vm0, %v58_v26 }
  0x46   :  { %5950 = vmatmul.mubr.msk.f32.gmra.mrb[2].mxu0 %vm80_vm0, %v59_v27 }
  0x47   :  { %5969 = vmatprep.mubr.msk.f32.mxu0 %vm6428_vm1, %v6426_v28 }
  0xb1   :  { %v190_v15 = vpop.permute.xlu0 %189 }
 0x115   :  { %v6509_v16 = vpop.f32.mrb[0].mxu0 }
 0x116   :  { %v6512_v17 = vadd.f32 %v6509_v16, %v181_v14  ;;  %v6514_v18 = vpop.f32.mrb[1].mxu0  ;;  %v193_v20 = vadd.f32 %v6509_v16, %v190_v15 }
 0x117   :  { %v192_v19 = vadd.f32 %v190_v15, %v6514_v18  ;;  %v6525_v21 = vadd.f32 %v181_v14, %v6514_v18 }
 0x119   :  { %512 = vrot.lane.b32.xlu1 %v192_v19, %s6422_s24  ;;  %508 = vrot.lane.b32.xlu0 %v192_v19, %s6423_s25 }
 0x11d   :  { %516 = vrot.lane.b32.xlu1 %v192_v19, %s6424_s26  ;;  %510 = vrot.lane.b32.xlu0 %v193_v20, %s6423_s25 }
 0x121   :  { %514 = vrot.lane.b32.xlu1 %v193_v20, %s6422_s24  ;;  %518 = vrot.lane.b32.xlu0 %v193_v20, %s6424_s26 }
 0x125   :  { %520 = vrot.lane.b32.xlu1 %v192_v19, %s6425_s27  ;;  %222 = vrot.lane.b32.xlu0 %v6525_v21, %s6422_s24 }
 0x129   :  { %216 = vrot.lane.b32.xlu1 %v6525_v21, %s6423_s25 }
 0x18b   :  { %v513_v22 = vpop.permute.xlu1 %512  ;;  %v509_v23 = vpop.permute.xlu0 %508 }
 0x18c   :  { %524 = vrot.lane.b32.xlu0 %v509_v23, %s6425_s27  ;;  %528 = vrot.lane.b32.xlu1 %v513_v22, %s6425_s27 }
 0x18f   :  { %v517_v24 = vpop.permute.xlu1 %516  ;;  %v511_v25 = vpop.permute.xlu0 %510 }
 0x190   :  { %532 = vrot.lane.b32.xlu0 %v517_v24, %s6425_s27  ;;  %228 = vrot.lane.b32.xlu1 %v6525_v21, %s6424_s26 }
 0x193   :  { %v515_v29 = vpop.permute.xlu1 %514  ;;  %v519_v30 = vpop.permute.xlu0 %518 }
 0x194   :  { %522 = vrot.lane.b32.xlu0 %v193_v20, %s6425_s27  ;;  %526 = vrot.lane.b32.xlu1 %v511_v25, %s6425_s27 }
 0x197   :  { %v521_v33 = vpop.permute.xlu1 %520  ;;  %v223_v36 = vpop.permute.xlu0 %222 }
 0x198   :  { %530 = vrot.lane.b32.xlu0 %v515_v29, %s6425_s27  ;;  %534 = vrot.lane.b32.xlu1 %v519_v30, %s6425_s27  ;;  %v234_v47 = vcombine.low %v6525_v21, %v223_v36  ;;  %v235_v48 = vcombine.high %v6525_v21, %v223_v36 }
 0x19a   :  { %v242_v62 = vrot.slane %v234_v47, %v6560_v46  ;;  %v249_v63 = vrot.slane %v235_v48, %v6560_v46 }
 0x19b   :  { %v217_v37 = vpop.permute.xlu1 %216 }
 0x19c   :  { %218 = vrot.lane.b32.xlu0 %v6512_v17, %s6423_s25  ;;  %224 = vrot.lane.b32.xlu1 %v6512_v17, %s6422_s24 }
 0x1a0   :  { %230 = vrot.lane.b32.xlu0 %v6512_v17, %s6424_s26  ;;  %199 = vrot.lane.b32.xlu1 %v197_v32, %s6427_s28 }
 0x1fe   :  { %v525_v41 = vpop.permute.xlu0 %524  ;;  %v529_v42 = vpop.permute.xlu1 %528 }
 0x1ff   :  { %v544_v44 = vcombine.low %v521_v33, %v529_v42  ;;  %v545_v45 = vcombine.high %v521_v33, %v529_v42 }
 0x201   :  { %v552_v56 = vrot.slane %v544_v44, %v6560_v46  ;;  %v559_v57 = vrot.slane %v545_v45, %v6560_v46 }
 0x202   :  { %v533_v49 = vpop.permute.xlu0 %532  ;;  %v229_v50 = vpop.permute.xlu1 %228 }
 0x203   :  { %v560_v51 = vcombine.low %v525_v41, %v533_v49  ;;  %v561_v52 = vcombine.high %v525_v41, %v533_v49  ;;  %v250_v53 = vcombine.low %v217_v37, %v229_v50  ;;  %v251_v54 = vcombine.high %v217_v37, %v229_v50 }
 0x205   :  { %v568_v58 = vrot.slane %v560_v51, %v6560_v46  ;;  %v575_v59 = vrot.slane %v561_v52, %v6560_v46  ;;  %v258_v60 = vrot.slane %v250_v53, %v6560_v46  ;;  %v265_v61 = vrot.slane %v251_v54, %v6560_v46 }
 0x206   :  { %v523_v3 = vpop.permute.xlu0 %522  ;;  %v527_v4 = vpop.permute.xlu1 %526 }
 0x207   :  { %v576_v5 = vcombine.low %v552_v56, %v568_v58  ;;  %v577_v6 = vcombine.high %v552_v56, %v568_v58  ;;  %v592_v7 = vcombine.low %v559_v57, %v575_v59  ;;  %v593_v8 = vcombine.high %v559_v57, %v575_v59 }
 0x208   :  { %v266_v9 = vcombine.low %v242_v62, %v258_v60  ;;  %v267_v10 = vcombine.high %v242_v62, %v258_v60  ;;  %v282_v11 = vcombine.low %v249_v63, %v265_v61  ;;  %v283_v12 = vcombine.high %v249_v63, %v265_v61 }
 0x209   :  { %v584_v14 = vrot.slane %v576_v5, %v6565_v55  ;;  %v591_v15 = vrot.slane %v577_v6, %v6565_v55  ;;  %v600_v19 = vrot.slane %v592_v7, %v6565_v55  ;;  %v607_v20 = vrot.slane %v593_v8, %v6565_v55 }
 0x20a   :  { %v6580_v21 = vrot.slane %v266_v9, %v6565_v55  ;;  %v6583_v22 = vrot.slane %v267_v10, %v6565_v55  ;;  %v531_v23 = vpop.permute.xlu0 %530  ;;  %v535_v24 = vpop.permute.xlu1 %534  ;;  %v6586_v30 = vrot.slane %v282_v11, %v6565_v55  ;;  %v6589_v32 = vrot.slane %v283_v12, %v6565_v55 }
 0x20b   :  { %v680_v25 = vcombine.low %v584_v14, %v591_v15  ;;  %v5758_v26 = vcombine.high %v584_v14, %v591_v15  ;;  %v696_v27 = vcombine.low %v600_v19, %v607_v20  ;;  %v5759_v29 = vcombine.high %v600_v19, %v607_v20 }
 0x20c   :  { %v370_v33 = vcombine.low %v6580_v21, %v6583_v22  ;;  %v612_v34 = vcombine.low %v523_v3, %v531_v23  ;;  %v613_v35 = vcombine.high %v523_v3, %v531_v23  ;;  %v628_v36 = vcombine.low %v527_v4, %v535_v24 }
 0x20d   :  { %v629_v37 = vcombine.high %v527_v4, %v535_v24  ;;  %v687_v40 = vrot.slane %v680_v25, %v6560_v46  ;;  %v695_v41 = vrot.slane %v5758_v26, %v6560_v46  ;;  %v703_v42 = vrot.slane %v696_v27, %v6560_v46 }
 0x20e   :  { %v219_v38 = vpop.permute.xlu0 %218  ;;  %v225_v39 = vpop.permute.xlu1 %224  ;;  %v711_v43 = vrot.slane %v5759_v29, %v6560_v46  ;;  %v620_v44 = vrot.slane %v612_v34, %v6560_v46  ;;  %v627_v45 = vrot.slane %v613_v35, %v6560_v46  ;;  %v636_v47 = vrot.slane %v628_v36, %v6560_v46 }
 0x20f   :  { %v643_v48 = vrot.slane %v629_v37, %v6560_v46  ;;  %v302_v49 = vcombine.low %v6512_v17, %v225_v39  ;;  %v303_v50 = vcombine.high %v6512_v17, %v225_v39  ;;  %v712_v51 = vcombine.low %v687_v40, %v695_v41 }
 0x210   :  { %v713_v52 = vcombine.high %v687_v40, %v695_v41  ;;  %v644_v53 = vcombine.low %v620_v44, %v636_v47  ;;  %v645_v54 = vcombine.high %v620_v44, %v636_v47  ;;  %v728_v63 = vcombine.low %v703_v42, %v711_v43 }
 0x211   :  { %v660_v56 = vcombine.low %v627_v45, %v643_v48  ;;  %v661_v57 = vcombine.high %v627_v45, %v643_v48  ;;  %v310_v58 = vrot.slane %v302_v49, %v6560_v46  ;;  %v317_v59 = vrot.slane %v303_v50, %v6560_v46 }
 0x212   :  { %v231_v60 = vpop.permute.xlu0 %230  ;;  %v200_v61 = vpop.permute.xlu1 %199  ;;  %v6606_v62 = vrot.slane %v712_v51, %v6565_v55  ;;  %v652_v3 = vrot.slane %v644_v53, %v6565_v55  ;;  %v659_v17 = vrot.slane %v645_v54, %v6565_v55  ;;  %v729_v20 = vcombine.high %v703_v42, %v711_v43 }
 0x213   :  { %v668_v4 = vrot.slane %v660_v56, %v6565_v55  ;;  %v675_v5 = vrot.slane %v661_v57, %v6565_v55  ;;  %v318_v6 = vcombine.low %v219_v38, %v231_v60  ;;  %v319_v7 = vcombine.high %v219_v38, %v231_v60 }
 0x214   :  { %v6613_v8 = vadd.f32 %v200_v61, %v6514_v18  ;;  %v6616_v9 = vadd.f32 %v6509_v16, %v200_v61  ;;  %v748_v10 = vcombine.low %v652_v3, %v659_v17  ;;  %v5760_v11 = vcombine.high %v652_v3, %v659_v17 }
 0x215   :  { %v764_v12 = vcombine.low %v668_v4, %v675_v5  ;;  %v5761_v14 = vcombine.high %v668_v4, %v675_v5  ;;  %v326_v15 = vrot.slane %v318_v6, %v6560_v46  ;;  %v333_v19 = vrot.slane %v319_v7, %v6560_v46 }
 0x216   :  { %v6621_v23 = vrot.slane %v728_v63, %v6565_v55  ;;  %822 = vrot.lane.b32.xlu0 %v6613_v8, %s6422_s24  ;;  %v6626_v18 = vrot.slane %v748_v10, %v6560_v46  ;;  %v6629_v16 = vrot.slane %v5760_v11, %v6560_v46  ;;  %818 = vrot.lane.b32.xlu1 %v6613_v8, %s6423_s25 }
 0x217   :  { %v6632_v24 = vrot.slane %v764_v12, %v6560_v46  ;;  %v6635_v25 = vrot.slane %v5761_v14, %v6560_v46  ;;  %v334_v26 = vcombine.low %v310_v58, %v326_v15  ;;  %v335_v27 = vcombine.high %v310_v58, %v326_v15 }
 0x218   :  { %v350_v29 = vcombine.low %v317_v59, %v333_v19  ;;  %v351_v34 = vcombine.high %v317_v59, %v333_v19  ;;  %v5754_v35 = vcombine.high %v6580_v21, %v6583_v22  ;;  %v386_v36 = vcombine.low %v6586_v30, %v6589_v32 }
 0x219   :  { %v5755_v37 = vcombine.high %v6586_v30, %v6589_v32  ;;  %v780_v38 = vcombine.low %v6626_v18, %v6629_v16  ;;  %v342_v39 = vrot.slane %v334_v26, %v6565_v55  ;;  %v349_v40 = vrot.slane %v335_v27, %v6565_v55 }
 0x21a   :  { %v358_v41 = vrot.slane %v350_v29, %v6565_v55  ;;  %v365_v42 = vrot.slane %v351_v34, %v6565_v55  ;;  %824 = vrot.lane.b32.xlu0 %v6616_v9, %s6422_s24  ;;  %v796_v43 = vcombine.low %v6632_v24, %v6635_v25  ;;  %v744_v30 = vcombine.low %v6606_v62, %v6621_v23 }
 0x21b   :  { %v727_v32 = vrot.slane %v713_v52, %v6565_v55  ;;  %v743_v44 = vrot.slane %v729_v20, %v6565_v55  ;;  %826 = vrot.lane.b32.xlu1 %v6613_v8, %s6424_s26  ;;  %v438_v45 = vcombine.low %v342_v39, %v349_v40  ;;  %v5756_v47 = vcombine.high %v342_v39, %v349_v40 }
 0x21c   :  { %v454_v48 = vcombine.low %v358_v41, %v365_v42  ;;  %v5757_v49 = vcombine.high %v358_v41, %v365_v42  ;;  %5953 = vmatpush3.xpose.msk.msra.mxu1 %vm1126_vm2, %v744_v30  ;;  %v377_v51 = vrot.slane %v370_v33, %v6560_v46  ;;  %v385_v53 = vrot.slane %v5754_v35, %v6560_v46  ;;  %v6736_v41 = vpop.f32.mrb[2].mxu0 }
 0x21d   :  { %v747_v50 = vcombine.high %v727_v32, %v743_v44  ;;  %v393_v52 = vrot.slane %v386_v36, %v6560_v46  ;;  %v445_v54 = vrot.slane %v438_v45, %v6560_v46  ;;  %v453_v56 = vrot.slane %v5756_v47, %v6560_v46  ;;  %5957 = vmatprep.subr.mxu1 %v6426_v28  ;;  %v6738_v42 = vpop.f32.mrb[3].mxu0 }
 0x21e   :  { %v461_v57 = vrot.slane %v454_v48, %v6560_v46  ;;  %v469_v58 = vrot.slane %v5757_v49, %v6560_v46  ;;  %v401_v59 = vrot.slane %v5755_v37, %v6560_v46  ;;  %v402_v21 = vcombine.low %v377_v51, %v385_v53 }
 0x21f   :  { %5968 = vmatpush3.xpose.msk.msra.mxu0 %vm1126_vm2, %v747_v50  ;;  %v403_v22 = vcombine.high %v377_v51, %v385_v53  ;;  %v470_v33 = vcombine.low %v445_v54, %v453_v56  ;;  %820 = vrot.lane.b32.xlu1 %v6616_v9, %s6423_s25  ;;  %v788_v4 = vrot.slane %v780_v38, %v6565_v55 }
 0x220   :  { %v486_v60 = vcombine.low %v461_v57, %v469_v58  ;;  %5977 = vmatprep.subr.mxu0 %v6426_v28  ;;  %v410_v61 = vrot.slane %v402_v21, %v6565_v55  ;;  %v418_v3 = vcombine.low %v393_v52, %v401_v59  ;;  %v419_v17 = vcombine.high %v393_v52, %v401_v59 }
 0x221   :  { %v417_v63 = vrot.slane %v403_v22, %v6565_v55  ;;  %v804_v5 = vrot.slane %v796_v43, %v6565_v55  ;;  %v781_v10 = vcombine.high %v6626_v18, %v6629_v16  ;;  %v797_v11 = vcombine.high %v6632_v24, %v6635_v25 }
 0x222   :  { %v426_v6 = vrot.slane %v418_v3, %v6565_v55  ;;  %v433_v7 = vrot.slane %v419_v17, %v6565_v55  ;;  %v478_v12 = vrot.slane %v470_v33, %v6565_v55  ;;  %v494_v20 = vrot.slane %v486_v60, %v6565_v55 }
 0x223   :  { %v813_v19 = vcombine.high %v788_v4, %v804_v5  ;;  %828 = vrot.lane.b32.xlu1 %v6616_v9, %s6424_s26  ;;  %v745_v26 = vcombine.high %v6606_v62, %v6621_v23  ;;  %v471_v27 = vcombine.high %v445_v54, %v453_v56  ;;  %v487_v29 = vcombine.high %v461_v57, %v469_v58 }
 0x224   :  { %v434_v14 = vcombine.low %v410_v61, %v426_v6  ;;  %v437_v15 = vcombine.high %v417_v63, %v433_v7  ;;  %v795_v18 = vrot.slane %v781_v10, %v6565_v55  ;;  %v811_v16 = vrot.slane %v797_v11, %v6565_v55 }
 0x225   :  { %v435_v24 = vcombine.high %v410_v61, %v426_v6  ;;  %v503_v62 = vcombine.high %v478_v12, %v494_v20  ;;  %v746_v23 = vcombine.low %v727_v32, %v743_v44  ;;  %v485_v25 = vrot.slane %v471_v27, %v6565_v55 }
 0x226   :  { %5955 = vmatmul.mubr.msk.f32.vlgmr.msra.gmra.mrb[0].mxu1 %vm1126_vm2, %v434_v14  ;;  %5970 = vmatmul.mubr.msk.f32.vlgmr.msra.gmra.mrb[4].mxu0 %vm1126_vm2, %v437_v15  ;;  %v501_v34 = vrot.slane %v487_v29, %v6565_v55  ;;  %v815_v35 = vcombine.high %v795_v18, %v811_v16  ;;  %v436_v36 = vcombine.low %v417_v63, %v433_v7  ;;  %v77_v43 = vand.u32 127, %v74_v0 }
 0x227   :  { %5958 = vmatpush3.xpose.msk.msra.mxu1 %vm1126_vm2, %v745_v26  ;;  %5959 = vmatprep.mubr.msk.f32.mxu1 %vm6428_vm1, %v6426_v28  ;;  %v812_v37 = vcombine.low %v788_v4, %v804_v5  ;;  %v814_v39 = vcombine.low %v795_v18, %v811_v16  ;;  %v6431_v44 = vmov -1e+30  }
 0x228   :  { %5962 = vmatprep.subr.mxu1 %v6426_v28  ;;  %5978 = vmatpush3.xpose.msk.msra.mxu0 %vm1126_vm2, %v813_v19  ;;  %v505_v38 = vcombine.high %v485_v25, %v501_v34  ;;  %v504_v40 = vcombine.low %v485_v25, %v501_v34  ;;  %vm78_vm3 = vcmp.ge.s32.totalorder %v6498_v1, %v77_v43 }
 0x229   :  { %5979 = vmatprep.mubr.msk.f32.mxu0 %vm6428_vm1, %v6426_v28  ;;  %5987 = vmatprep.subr.mxu0 %v6426_v28  ;;  %v79_v45 = vsel %vm78_vm3, 0.0, %v6431_v44 }
 0x22a   :  { %5960 = vmatmul.mubr.msk.f32.vlgmr.msra.gmra.mrb[2].mxu1 %vm1126_vm2, %v435_v24  ;;  %830 = vrot.lane.b32.xlu1 %v6613_v8, %s6427_s28  ;;  %v502_v8 = vcombine.low %v478_v12, %v494_v20 }
 0x22b   :  { %5963 = vmatpush3.xpose.msk.msra.mxu1 %vm1126_vm2, %v746_v23  ;;  %5964 = vmatprep.mubr.msk.f32.mxu1 %vm6428_vm1, %v6426_v28 }
 0x22c   :  { %5972 = vmatprep.subr.mxu1 %v6426_v28  ;;  %5980 = vmatmul.mubr.msk.f32.vlgmr.msra.gmra.mrb[6].mxu0 %vm1126_vm2, %v503_v62 }
 0x22d   :  { %5988 = vmatpush3.xpose.msk.msra.mxu0 %vm1126_vm2, %v815_v35  ;;  %5989 = vmatprep.mubr.msk.f32.mxu0 %vm6428_vm1, %v6426_v28 }
 0x22e   :  { %5965 = vmatmul.mubr.msk.f32.vlgmr.msra.gmra.mrb[4].mxu1 %vm1126_vm2, %v436_v36  ;;  %5997 = vmatprep.subr.mxu0 %v6426_v28 }
 0x22f   :  { %5973 = vmatpush3.xpose.msk.msra.mxu1 %vm1126_vm2, %v812_v37  ;;  %5974 = vmatprep.mubr.msk.f32.mxu1 %vm6428_vm1, %v6426_v28 }
 0x230   :  { %5982 = vmatprep.subr.mxu1 %v6426_v28  ;;  %5990 = vmatmul.mubr.msk.f32.vlgmr.msra.gmra.mrb[8].mxu0 %vm1126_vm2, %v505_v38 }
 0x231   :  { %5999 = vmatprep.mubr.msk.f32.mxu0 %vm6428_vm1, %v6426_v28 }
 0x232   :  { %5975 = vmatmul.mubr.msk.f32.vlgmr.msra.gmra.mrb[6].mxu1 %vm1126_vm2, %v502_v8 }
 0x233   :  { %5983 = vmatpush3.xpose.msk.msra.mxu1 %vm1126_vm2, %v814_v39  ;;  %5984 = vmatprep.mubr.msk.f32.mxu1 %vm6428_vm1, %v6426_v28 }
 0x234   :  { %5992 = vmatprep.subr.mxu1 %v6426_v28 }
 0x236   :  { %5985 = vmatmul.mubr.msk.f32.vlgmr.msra.gmra.mrb[8].mxu1 %vm1126_vm2, %v504_v40 }
 0x237   :  { %5994 = vmatprep.mubr.msk.f32.mxu1 %vm6428_vm1, %v6426_v28 }
 0x288   :  { %v819_v29 = vpop.permute.xlu1 %818  ;;  %v823_v18 = vpop.permute.xlu0 %822 }
 0x28c   :  { %v6765_v36 = vpop.permute.xlu0 %824 }
 0x28d   :  { %v827_v16 = vpop.permute.xlu1 %826 }
 0x291   :  { %v6761_v34 = vpop.permute.xlu1 %820 }
 0x295   :  { %v6763_v35 = vpop.permute.xlu1 %828 }
 0x29c   :  { %v831_v37 = vpop.permute.xlu1 %830 }
 0x2f9   :  { %v1199_v30 = vpop.f32.mrb[0].mxu1  ;;  %v1427_v32 = vpop.f32.mrb[4].mxu0 }
 0x2fa   :  { %v1735_v47 = vmul.f32 0.35355338, %v1199_v30  ;;  %v1738_v48 = vmul.f32 0.35355338, %v1427_v32  ;;  %v5956_v49 = vpop.f32.mrb[1].mxu1  ;;  %v5971_v50 = vpop.f32.mrb[5].mxu0 }
 0x2fc   :  { %v1743_v51 = vadd.f32 %v1735_v47, %v79_v45  ;;  %v1746_v57 = vadd.f32 %v1738_v48, %v79_v45 }
 0x2fd   :  { %v1275_v53 = vpop.f32.mrb[2].mxu1 }
 0x2fe   :  { %v1736_v52 = vmul.f32 0.35355338, %v1275_v53  ;;  %v5961_v54 = vpop.f32.mrb[3].mxu1  ;;  %v1751_v56 = vsel %vm1126_vm2, %v1743_v51, -inf  ;;  %v1760_v63 = vsel %vm1126_vm2, %v1746_v57, -inf }
 0x2ff   :  { %1752 = vmax.xlane.f32.xlu0 %v1751_v56  ;;  %v1579_v58 = vpop.f32.mrb[6].mxu0 }
 0x300   :  { %v1744_v0 = vadd.f32 %v1736_v52, %v79_v45  ;;  %v1740_v59 = vmul.f32 0.35355338, %v1579_v58  ;;  %v5981_v21 = vpop.f32.mrb[7].mxu0 }
 0x301   :  { %v1351_v22 = vpop.f32.mrb[4].mxu1 }
 0x302   :  { %v1737_v33 = vmul.f32 0.35355338, %v1351_v22  ;;  %v5966_v60 = vpop.f32.mrb[5].mxu1  ;;  %v1754_v61 = vsel %vm1126_vm2, %v1744_v0, -inf  ;;  %v1748_v3 = vadd.f32 %v1740_v59, %v79_v45 }
 0x303   :  { %1755 = vmax.xlane.f32.xlu1 %v1754_v61  ;;  %1761 = vmax.xlane.f32.xlu0 %v1760_v63  ;;  %v1731_v17 = vpop.f32.mrb[8].mxu0 }
 0x304   :  { %v5991_v4 = vpop.f32.mrb[9].mxu0  ;;  %v1766_v5 = vsel %vm1126_vm2, %v1748_v3, -inf  ;;  %v1742_v10 = vmul.f32 0.35355338, %v1731_v17  ;;  %v1745_v11 = vadd.f32 %v1737_v33, %v79_v45 }
 0x305   :  { %v1503_v6 = vpop.f32.mrb[6].mxu1 }
 0x306   :  { %v5976_v7 = vpop.f32.mrb[7].mxu1  ;;  %v1757_v19 = vsel %vm1126_vm2, %v1745_v11, -inf  ;;  %v1750_v20 = vadd.f32 %v1742_v10, %v79_v45  ;;  %v1739_v24 = vmul.f32 0.35355338, %v1503_v6 }
 0x307   :  { %1767 = vmax.xlane.f32.xlu0 %v1766_v5 }
 0x308   :  { %v1772_v27 = vsel %vm1126_vm2, %v1750_v20, -inf  ;;  %v6753_v62 = vadd.f32 %v1739_v24, %v79_v45 }
 0x309   :  { %v1655_v12 = vpop.f32.mrb[8].mxu1 }
 0x30a   :  { %v1741_v14 = vmul.f32 0.35355338, %v1655_v12  ;;  %v5986_v15 = vpop.f32.mrb[9].mxu1  ;;  %v1763_v23 = vsel %vm1126_vm2, %v6753_v62, -inf }
 0x30b   :  { %1758 = vmax.xlane.f32.xlu0 %v1757_v19 }
 0x30c   :  { %v6747_v26 = vadd.f32 %v1741_v14, %v79_v45 }
 0x30e   :  { %v1769_v25 = vsel %vm1126_vm2, %v6747_v26, -inf }
 0x30f   :  { %1773 = vmax.xlane.f32.xlu0 %v1772_v27 }
 0x314   :  { %838 = vrot.lane.b32.xlu1 %v823_v18, %s6427_s28 }
 0x318   :  { %842 = vrot.lane.b32.xlu1 %v827_v16, %s6427_s28 }
 0x325   :  { %834 = vrot.lane.b32.xlu0 %v819_v29, %s6427_s28 }
 0x33c   :  { %1764 = vmax.xlane.f32.xlu1 %v1763_v23 }
 0x340   :  { %1770 = vmax.xlane.f32.xlu1 %v1769_v25 }
 0x351   :  { %832 = vrot.lane.b32.xlu1 %v6616_v9, %s6427_s28 }
 0x38c   :  { %v1753_v8 = vpop.xlane.xlu0 %1752 }
 0x38d   :  { %v1775_v38 = vsub.f32 %v1743_v51, %v1753_v8 }
 0x38f   :  { %v1783_v39 = vmul.f32 1.442695, %v1775_v38 }
 0x390   :  { %v1756_v40 = vpop.xlane.xlu1 %1755  ;;  %v1762_v43 = vpop.xlane.xlu0 %1761 }
 0x391   :  { %6236 = vpow2.f32 %v1783_v39  ;;  %v1776_v30 = vsub.f32 %v1744_v0, %v1756_v40  ;;  %v1778_v32 = vsub.f32 %v1746_v57, %v1762_v43 }
 0x393   :  { %v1785_v44 = vmul.f32 1.442695, %v1776_v30  ;;  %v1789_v45 = vmul.f32 1.442695, %v1778_v32 }
 0x394   :  { %v1768_v47 = vpop.xlane.xlu0 %1767  ;;  %v839_v53 = vpop.permute.xlu1 %838 }
 0x395   :  { %6238 = vpow2.f32 %v1785_v44  ;;  %v1780_v9 = vsub.f32 %v1748_v3, %v1768_v47  ;;  %v854_v0 = vcombine.low %v831_v37, %v839_v53  ;;  %v855_v59 = vcombine.high %v831_v37, %v839_v53 }
 0x396   :  { %6240 = vpow2.f32 %v1789_v45 }
 0x397   :  { %v1793_v48 = vmul.f32 1.442695, %v1780_v9  ;;  %v862_v5 = vrot.slane %v854_v0, %v6560_v46  ;;  %v869_v6 = vrot.slane %v855_v59, %v6560_v46 }
 0x398   :  { %v1759_v49 = vpop.xlane.xlu0 %1758  ;;  %v843_v33 = vpop.permute.xlu1 %842 }
 0x399   :  { %6242 = vpow2.f32 %v1793_v48  ;;  %v1777_v50 = vsub.f32 %v1745_v11, %v1759_v49 }
 0x39b   :  { %v6767_v52 = vpop.eup %6236  ;;  %v1787_v51 = vmul.f32 1.442695, %v1777_v50 }
 0x39c   :  { %v1799_v54 = vsel %vm1126_vm2, %v6767_v52, 0.0  ;;  %v1774_v56 = vpop.xlane.xlu0 %1773 }
 0x39d   :  { %6244 = vpow2.f32 %v1787_v51  ;;  %1800 = vadd.xlane.f32.xlu0 %v1799_v54  ;;  %v1782_v57 = vsub.f32 %v1750_v20, %v1774_v56 }
 0x39f   :  { %v6771_v58 = vpop.eup %6238  ;;  %v1797_v21 = vmul.f32 1.442695, %v1782_v57 }
 0x3a0   :  { %v6773_v22 = vpop.eup %6240  ;;  %v1802_v60 = vsel %vm1126_vm2, %v6771_v58, 0.0  ;;  %v835_v61 = vpop.permute.xlu0 %834 }
 0x3a1   :  { %1803 = vadd.xlane.f32.xlu1 %v1802_v60  ;;  %v1808_v63 = vsel %vm1126_vm2, %v6773_v22, 0.0  ;;  %6246 = vpow2.f32 %v1797_v21  ;;  %v870_v3 = vcombine.low %v835_v61, %v843_v33  ;;  %v871_v17 = vcombine.high %v835_v61, %v843_v33 }
 0x3a2   :  { %1809 = vadd.xlane.f32.xlu0 %v1808_v63 }
 0x3a3   :  { %v6779_v4 = vpop.eup %6242  ;;  %v878_v7 = vrot.slane %v870_v3, %v6560_v46  ;;  %v885_v10 = vrot.slane %v871_v17, %v6560_v46 }
 0x3a4   :  { %v1814_v11 = vsel %vm1126_vm2, %v6779_v4, 0.0 }
 0x3a5   :  { %v886_v12 = vcombine.low %v862_v5, %v878_v7  ;;  %v887_v14 = vcombine.high %v862_v5, %v878_v7  ;;  %v902_v15 = vcombine.low %v869_v6, %v885_v10  ;;  %v903_v19 = vcombine.high %v869_v6, %v885_v10  ;;  %1815 = vadd.xlane.f32.xlu1 %v1814_v11 }
 0x3a7   :  { %v6787_v20 = vpop.eup %6244  ;;  %v894_v27 = vrot.slane %v886_v12, %v6565_v55  ;;  %v901_v29 = vrot.slane %v887_v14, %v6565_v55  ;;  %v910_v18 = vrot.slane %v902_v15, %v6565_v55  ;;  %v917_v16 = vrot.slane %v903_v19, %v6565_v55 }
 0x3a8   :  { %v1805_v24 = vsel %vm1126_vm2, %v6787_v20, 0.0 }
 0x3a9   :  { %v990_v23 = vcombine.low %v894_v27, %v901_v29  ;;  %v5762_v25 = vcombine.high %v894_v27, %v901_v29  ;;  %v1006_v37 = vcombine.low %v910_v18, %v917_v16  ;;  %v5763_v8 = vcombine.high %v910_v18, %v917_v16  ;;  %1806 = vadd.xlane.f32.xlu0 %v1805_v24 }
 0x3ab   :  { %v6795_v38 = vpop.eup %6246  ;;  %v997_v39 = vrot.slane %v990_v23, %v6560_v46  ;;  %v1005_v40 = vrot.slane %v5762_v25, %v6560_v46  ;;  %v1013_v43 = vrot.slane %v1006_v37, %v6560_v46  ;;  %v1021_v30 = vrot.slane %v5763_v8, %v6560_v46 }
 0x3ac   :  { %v1820_v32 = vsel %vm1126_vm2, %v6795_v38, 0.0 }
 0x3ad   :  { %1821 = vadd.xlane.f32.xlu0 %v1820_v32  ;;  %v1022_v44 = vcombine.low %v997_v39, %v1005_v40  ;;  %v1038_v45 = vcombine.low %v1013_v43, %v1021_v30  ;;  %v1023_v47 = vcombine.high %v997_v39, %v1005_v40  ;;  %v1039_v9 = vcombine.high %v1013_v43, %v1021_v30 }
 0x3af   :  { %v1030_v48 = vrot.slane %v1022_v44, %v6565_v55  ;;  %v1046_v49 = vrot.slane %v1038_v45, %v6565_v55  ;;  %v1037_v50 = vrot.slane %v1023_v47, %v6565_v55  ;;  %v1053_v53 = vrot.slane %v1039_v9, %v6565_v55 }
 0x3b1   :  { %v1054_v51 = vcombine.low %v1030_v48, %v1046_v49  ;;  %v1055_v54 = vcombine.high %v1030_v48, %v1046_v49  ;;  %v1056_v56 = vcombine.low %v1037_v50, %v1053_v53  ;;  %v1057_v57 = vcombine.high %v1037_v50, %v1053_v53 }
 0x3b3   :  { %5993 = vmatpush3.msra.mxu1 %v1054_v51  ;;  %5998 = vmatpush3.msra.mxu0 %v1055_v54 }
 0x3b4   :  { %6002 = vmatprep.subr.mxu1 %v6426_v28  ;;  %6007 = vmatprep.subr.mxu0 %v6426_v28 }
 0x3b6   :  { %840 = vrot.lane.b32.xlu1 %v6765_v36, %s6427_s28 }
 0x3ba   :  { %844 = vrot.lane.b32.xlu1 %v6763_v35, %s6427_s28 }
 0x3c9   :  { %v1765_v0 = vpop.xlane.xlu1 %1764 }
 0x3ca   :  { %v1779_v59 = vsub.f32 %v6753_v62, %v1765_v0 }
 0x3cc   :  { %v1791_v21 = vmul.f32 1.442695, %v1779_v59 }
 0x3cd   :  { %v1771_v33 = vpop.xlane.xlu1 %1770 }
 0x3ce   :  { %6248 = vpow2.f32 %v1791_v21  ;;  %v1781_v60 = vsub.f32 %v6747_v26, %v1771_v33 }
 0x3d0   :  { %v1795_v61 = vmul.f32 1.442695, %v1781_v60 }
 0x3d1   :  { %v833_v62 = vpop.permute.xlu1 %832 }
 0x3d2   :  { %6250 = vpow2.f32 %v1795_v61 }
 0x3d8   :  { %v6815_v63 = vpop.eup %6248 }
 0x3d9   :  { %v1811_v3 = vsel %vm1126_vm2, %v6815_v63, 0.0 }
 0x3da   :  { %1812 = vadd.xlane.f32.xlu0 %v1811_v3 }
 0x3dc   :  { %v6819_v36 = vpop.eup %6250 }
 0x3dd   :  { %v1817_v35 = vsel %vm1126_vm2, %v6819_v36, 0.0 }
 0x3de   :  { %1818 = vadd.xlane.f32.xlu0 %v1817_v35 }
 0x3f4   :  { %836 = vrot.lane.b32.xlu0 %v6761_v34, %s6427_s28 }
 0x42a   :  { %v1801_v17 = vpop.xlane.xlu0 %1800 }
 0x42b   :  { %6252 = vrcp.f32 %v1801_v17 }
 0x42e   :  { %v1804_v26 = vpop.xlane.xlu1 %1803 }
 0x42f   :  { %6254 = vrcp.f32 %v1804_v26  ;;  %v1810_v5 = vpop.xlane.xlu0 %1809 }
 0x430   :  { %6256 = vrcp.f32 %v1810_v5 }
 0x432   :  { %v1816_v15 = vpop.xlane.xlu1 %1815 }
 0x435   :  { %v6253_v6 = vpop.eup %6252 }
 0x436   :  { %v1831_v7 = vmul.f32 %v6253_v6, %v6767_v52  ;;  %v1807_v10 = vpop.xlane.xlu0 %1806  ;;  %v841_v29 = vpop.permute.xlu1 %840 }
 0x437   :  { %6258 = vrcp.f32 %v1807_v10  ;;  %v922_v18 = vcombine.low %v833_v62, %v841_v29  ;;  %v923_v16 = vcombine.high %v833_v62, %v841_v29 }
 0x438   :  { %5995 = vmatmul.mubr.msk.f32.vlgmr.msra.gmra.mrb[10].mxu1 %vm1126_vm2, %v1831_v7  ;;  %6260 = vrcp.f32 %v1816_v15 }
 0x439   :  { %v6255_v11 = vpop.eup %6254  ;;  %6003 = vmatpush3.msra.mxu1 %v1056_v56  ;;  %6004 = vmatprep.mubr.msk.f32.mxu1 %vm6428_vm1, %v6426_v28  ;;  %v930_v8 = vrot.slane %v922_v18, %v6560_v46 }
 0x43a   :  { %v1832_v34 = vmul.f32 %v6255_v11, %v6771_v58  ;;  %6012 = vmatprep.subr.mxu1 %v6426_v28  ;;  %v6257_v12 = vpop.eup %6256  ;;  %v1822_v19 = vpop.xlane.xlu0 %1821 }
 0x43b   :  { %v1834_v52 = vmul.f32 %v6257_v12, %v6773_v22  ;;  %v845_v24 = vpop.permute.xlu1 %844 }
 0x43c   :  { %6000 = vmatmul.mubr.msk.f32.vlgmr.msra.gmra.mrb[10].mxu0 %vm1126_vm2, %v1832_v34 }
 0x43d   :  { %6008 = vmatpush3.msra.mxu0 %v1057_v57  ;;  %6009 = vmatprep.mubr.msk.f32.mxu0 %vm6428_vm1, %v6426_v28 }
 0x43e   :  { %6017 = vmatprep.subr.mxu0 %v6426_v28 }
 0x440   :  { %6010 = vmatmul.mubr.msk.f32.vlgmr.msra.gmra.mrb[12].mxu0 %vm1126_vm2, %v1834_v52 }
 0x441   :  { %v6259_v14 = vpop.eup %6258  ;;  %6019 = vmatprep.mubr.msk.f32.mxu0 %vm6428_vm1, %v6426_v28 }
 0x442   :  { %v1833_v58 = vmul.f32 %v6259_v14, %v6787_v20  ;;  %v937_v20 = vrot.slane %v923_v16, %v6560_v46  ;;  %v6261_v59 = vpop.eup %6260 }
 0x443   :  { %v1836_v11 = vmul.f32 %v6261_v59, %v6779_v4 }
 0x444   :  { %6005 = vmatmul.mubr.msk.f32.vlgmr.msra.gmra.mrb[12].mxu1 %vm1126_vm2, %v1833_v58 }
 0x445   :  { %6014 = vmatprep.mubr.msk.f32.mxu1 %vm6428_vm1, %v6426_v28 }
 0x467   :  { %v1813_v27 = vpop.xlane.xlu0 %1812 }
 0x468   :  { %6262 = vrcp.f32 %v1813_v27 }
 0x469   :  { %6264 = vrcp.f32 %v1822_v19 }
 0x46b   :  { %v1819_v22 = vpop.xlane.xlu0 %1818 }
 0x46c   :  { %6266 = vrcp.f32 %v1819_v22 }
 0x46f   :  { %v837_v23 = vpop.permute.xlu0 %836 }
 0x470   :  { %v938_v25 = vcombine.low %v837_v23, %v845_v24  ;;  %v939_v37 = vcombine.high %v837_v23, %v845_v24 }
 0x472   :  { %v946_v39 = vrot.slane %v938_v25, %v6560_v46  ;;  %v953_v40 = vrot.slane %v939_v37, %v6560_v46  ;;  %v6263_v3 = vpop.eup %6262 }
 0x473   :  { %v6265_v17 = vpop.eup %6264  ;;  %v1835_v34 = vmul.f32 %v6263_v3, %v6815_v63 }
 0x474   :  { %v954_v43 = vcombine.low %v930_v8, %v946_v39  ;;  %v955_v30 = vcombine.high %v930_v8, %v946_v39  ;;  %v970_v32 = vcombine.low %v937_v20, %v953_v40  ;;  %v971_v44 = vcombine.high %v937_v20, %v953_v40 }
 0x475   :  { %v1838_v14 = vmul.f32 %v6265_v17, %v6795_v38 }
 0x476   :  { %v962_v45 = vrot.slane %v954_v43, %v6565_v55  ;;  %v969_v47 = vrot.slane %v955_v30, %v6565_v55  ;;  %v978_v9 = vrot.slane %v970_v32, %v6565_v55  ;;  %v985_v48 = vrot.slane %v971_v44, %v6565_v55  ;;  %v6267_v10 = vpop.eup %6266 }
 0x477   :  { %v1837_v58 = vmul.f32 %v6267_v10, %v6819_v36 }
 0x478   :  { %v1058_v49 = vcombine.low %v962_v45, %v969_v47  ;;  %v5764_v50 = vcombine.high %v962_v45, %v969_v47  ;;  %v1074_v53 = vcombine.low %v978_v9, %v985_v48  ;;  %v5765_v51 = vcombine.high %v978_v9, %v985_v48 }
 0x47a   :  { %v1065_v54 = vrot.slane %v1058_v49, %v6560_v46  ;;  %v1073_v56 = vrot.slane %v5764_v50, %v6560_v46  ;;  %v1081_v57 = vrot.slane %v1074_v53, %v6560_v46  ;;  %v1089_v0 = vrot.slane %v5765_v51, %v6560_v46 }
 0x47c   :  { %v1090_v21 = vcombine.low %v1065_v54, %v1073_v56  ;;  %v1106_v33 = vcombine.low %v1081_v57, %v1089_v0  ;;  %v1091_v60 = vcombine.high %v1065_v54, %v1073_v56  ;;  %v1107_v61 = vcombine.high %v1081_v57, %v1089_v0 }
 0x47e   :  { %v1098_v35 = vrot.slane %v1090_v21, %v6565_v55  ;;  %v1114_v62 = vrot.slane %v1106_v33, %v6565_v55  ;;  %v1105_v26 = vrot.slane %v1091_v60, %v6565_v55  ;;  %v1121_v5 = vrot.slane %v1107_v61, %v6565_v55 }
 0x480   :  { %v1122_v6 = vcombine.low %v1098_v35, %v1114_v62  ;;  %v1123_v7 = vcombine.high %v1098_v35, %v1114_v62  ;;  %v1124_v12 = vcombine.low %v1105_v26, %v1121_v5  ;;  %v1125_v52 = vcombine.high %v1105_v26, %v1121_v5 }
 0x482   :  { %6013 = vmatpush3.msra.mxu1 %v1122_v6  ;;  %6018 = vmatpush3.msra.mxu0 %v1123_v7 }
 0x483   :  { %6015 = vmatmul.mubr.msk.f32.vlgmr.msra.gmra.mrb[14].mxu1 %vm1126_vm2, %v1835_v34  ;;  %6020 = vmatmul.mubr.msk.f32.vlgmr.msra.gmra.mrb[14].mxu0 %vm1126_vm2, %v1836_v11 }
 0x484   :  { %6022 = vmatprep.subr.mxu1 %v6426_v28  ;;  %6027 = vmatprep.subr.mxu0 %v6426_v28 }
 0x485   :  { %6023 = vmatpush3.msra.mxu1 %v1124_v12  ;;  %6028 = vmatpush3.msra.mxu0 %v1125_v52 }
 0x486   :  { %6024 = vmatprep.mubr.msk.f32.mxu1 %vm6428_vm1, %v6426_v28  ;;  %6029 = vmatprep.mubr.msk.f32.mxu0 %vm6428_vm1, %v6426_v28 }
 0x487   :  { %6025 = vmatmul.mubr.msk.f32.vlgmr.msra.gmra.mrb[16].mxu1 %vm1126_vm2, %v1837_v58  ;;  %6030 = vmatmul.mubr.msk.f32.vlgmr.msra.gmra.mrb[16].mxu0 %vm1126_vm2, %v1838_v14 }
 0x50b   :  { %v1908_v4 = vpop.f32.mrb[10].mxu1 }
 0x50c   :  { %v5996_v63 = vpop.f32.mrb[11].mxu1 }
 0x50f   :  { %v1981_v15 = vpop.f32.mrb[10].mxu0 }
 0x510   :  { %v6001_v19 = vpop.f32.mrb[11].mxu0 }
 0x513   :  { %v2127_v27 = vpop.f32.mrb[12].mxu0 }
 0x514   :  { %v2439_v38 = vcombine.low %v1981_v15, %v2127_v27  ;;  %v2440_v29 = vcombine.high %v1981_v15, %v2127_v27  ;;  %v6011_v36 = vpop.f32.mrb[13].mxu0 }
 0x516   :  { %v2447_v23 = vrot.slane %v2439_v38, %v6560_v46  ;;  %v2454_v25 = vrot.slane %v2440_v29, %v6560_v46 }
 0x517   :  { %v2054_v22 = vpop.f32.mrb[12].mxu1 }
 0x518   :  { %v2423_v18 = vcombine.low %v1908_v4, %v2054_v22  ;;  %v2424_v16 = vcombine.high %v1908_v4, %v2054_v22  ;;  %v6006_v24 = vpop.f32.mrb[13].mxu1 }
 0x51a   :  { %v2431_v37 = vrot.slane %v2423_v18, %v6560_v46  ;;  %v2438_v8 = vrot.slane %v2424_v16, %v6560_v46  ;;  %v6904_v18 = vld [vmem:[#allocation5 + $0x8] sm:$0xff]  ;;  %v6906_v16 = vld [vmem:[#allocation5 + $0x20] sm:$0xff] }
 0x51c   :  { %v2455_v20 = vcombine.low %v2431_v37, %v2447_v23  ;;  %v2456_v39 = vcombine.high %v2431_v37, %v2447_v23  ;;  %v2471_v40 = vcombine.low %v2438_v8, %v2454_v25  ;;  %v2472_v43 = vcombine.high %v2438_v8, %v2454_v25 }
 0x51d   :  { %v6164_v8 = vpack.c.bf16 %v6906_v16, %v6904_v18 }
 0x51e   :  { %v2463_v30 = vrot.slane %v2455_v20, %v6565_v55  ;;  %v2470_v32 = vrot.slane %v2456_v39, %v6565_v55  ;;  %v2479_v44 = vrot.slane %v2471_v40, %v6565_v55  ;;  %v2486_v45 = vrot.slane %v2472_v43, %v6565_v55 }
 0x51f   :  { %6165 = vmatprep.subr.bf16.mxu1 %v6164_v8 }
 0x520   :  { %v2559_v47 = vcombine.low %v2463_v30, %v2470_v32  ;;  %v5790_v9 = vcombine.high %v2463_v30, %v2470_v32  ;;  %v2575_v48 = vcombine.low %v2479_v44, %v2486_v45  ;;  %v5791_v49 = vcombine.high %v2479_v44, %v2486_v45  ;;  %v6914_v30 = vld [vmem:[#allocation5 + $0x38] sm:$0xff]  ;;  %v6916_v32 = vld [vmem:[#allocation5 + $0x50] sm:$0xff]  ;;  %6167 = vmatpush3.bf16.msra.mxu1 %v6164_v8 }
 0x522   :  { %v2566_v50 = vrot.slane %v2559_v47, %v6560_v46  ;;  %v2574_v53 = vrot.slane %v5790_v9, %v6560_v46  ;;  %v2582_v51 = vrot.slane %v2575_v48, %v6560_v46  ;;  %v2590_v54 = vrot.slane %v5791_v49, %v6560_v46 }
 0x523   :  { %v6168_v48 = vpack.c.bf16 %v6916_v32, %v6914_v30 }
 0x524   :  { %v2591_v56 = vcombine.low %v2566_v50, %v2574_v53  ;;  %v2607_v57 = vcombine.low %v2582_v51, %v2590_v54  ;;  %v2592_v0 = vcombine.high %v2566_v50, %v2574_v53  ;;  %v2608_v59 = vcombine.high %v2582_v51, %v2590_v54 }
 0x525   :  { %6169 = vmatprep.subr.bf16.mxu1 %v6168_v48 }
 0x526   :  { %v6886_v21 = vrot.slane %v2591_v56, %v6565_v55  ;;  %v6889_v33 = vrot.slane %v2607_v57, %v6565_v55  ;;  %v2606_v60 = vrot.slane %v2592_v0, %v6565_v55  ;;  %v2622_v61 = vrot.slane %v2608_v59, %v6565_v55  ;;  %6171 = vmatpush3.bf16.msra.mxu1 %v6168_v48 }
 0x527   :  { %6054 = vmatprep.subr.mxu1 %v6426_v28 }
 0x528   :  { %v2624_v3 = vcombine.high %v6886_v21, %v6889_v33  ;;  %v2623_v35 = vcombine.low %v6886_v21, %v6889_v33  ;;  %v2625_v62 = vcombine.low %v2606_v60, %v2622_v61  ;;  %v2626_v17 = vcombine.high %v2606_v60, %v2622_v61  ;;  %v6946_v33 = vld [vmem:[#allocation7] sm:$0xff] }
 0x529   :  { %v2729_v21 = vsub.s32 3, %v6498_v1 }
 0x52a   :  { %2697 = vrot.lane.b32.xlu0 %v2624_v3, %s6419_s9 }
 0x52e   :  { %2705 = vrot.lane.b32.xlu0 %v2625_v62, %s6432_s29 }
 0x532   :  { %2713 = vrot.lane.b32.xlu0 %v2626_v17, %s6416_s23 }
 0x556   :  { %v2200_v26 = vpop.f32.mrb[14].mxu1  ;;  %v2273_v5 = vpop.f32.mrb[14].mxu0 }
 0x557   :  { %v6016_v6 = vpop.f32.mrb[15].mxu1  ;;  %v6021_v7 = vpop.f32.mrb[15].mxu0 }
 0x55a   :  { %v2346_v10 = vpop.f32.mrb[16].mxu1  ;;  %v2419_v11 = vpop.f32.mrb[16].mxu0 }
 0x55b   :  { %v2491_v34 = vcombine.low %v2200_v26, %v2346_v10  ;;  %v2492_v12 = vcombine.high %v2200_v26, %v2346_v10  ;;  %v2507_v52 = vcombine.low %v2273_v5, %v2419_v11  ;;  %v2508_v14 = vcombine.high %v2273_v5, %v2419_v11  ;;  %v6026_v58 = vpop.f32.mrb[17].mxu1  ;;  %v6031_v4 = vpop.f32.mrb[17].mxu0 }
 0x55d   :  { %v2499_v63 = vrot.slane %v2491_v34, %v6560_v46  ;;  %v2506_v15 = vrot.slane %v2492_v12, %v6560_v46  ;;  %v2515_v19 = vrot.slane %v2507_v52, %v6560_v46  ;;  %v2522_v27 = vrot.slane %v2508_v14, %v6560_v46 }
 0x55f   :  { %v2523_v38 = vcombine.low %v2499_v63, %v2515_v19  ;;  %v2524_v29 = vcombine.high %v2499_v63, %v2515_v19  ;;  %v2539_v36 = vcombine.low %v2506_v15, %v2522_v27  ;;  %v2540_v22 = vcombine.high %v2506_v15, %v2522_v27  ;;  %v6313_v19 = vld [vmem:[#allocation2 + $0x8] sm:$0xff] }
 0x561   :  { %v2531_v24 = vrot.slane %v2523_v38, %v6565_v55  ;;  %v2538_v23 = vrot.slane %v2524_v29, %v6565_v55  ;;  %v2547_v25 = vrot.slane %v2539_v36, %v6565_v55  ;;  %v2554_v37 = vrot.slane %v2540_v22, %v6565_v55  ;;  %v6314_v38 = vld [vmem:[#allocation2] sm:$0xff] }
 0x563   :  { %v2627_v20 = vcombine.low %v2531_v24, %v2538_v23  ;;  %v5792_v39 = vcombine.high %v2531_v24, %v2538_v23  ;;  %v2643_v40 = vcombine.low %v2547_v25, %v2554_v37  ;;  %v5793_v43 = vcombine.high %v2547_v25, %v2554_v37  ;;  %v73_v23 = vld [vmem:[#allocation7 + $0x8] sm:$0xff] }
 0x564   :  { %v6216_v24 = vpack.i.bf16 %v6906_v16, %v6904_v18  ;;  %v207_v25 = vrot.slane %v73_v23, %v180_v13 }
 0x565   :  { %v2634_v44 = vrot.slane %v2627_v20, %v6560_v46  ;;  %v2642_v45 = vrot.slane %v5792_v39, %v6560_v46  ;;  %v2650_v47 = vrot.slane %v2643_v40, %v6560_v46  ;;  %v2658_v9 = vrot.slane %v5793_v43, %v6560_v46 }
 0x567   :  { %v2659_v49 = vcombine.low %v2634_v44, %v2642_v45  ;;  %v2675_v50 = vcombine.low %v2650_v47, %v2658_v9  ;;  %v2660_v53 = vcombine.high %v2634_v44, %v2642_v45  ;;  %v2676_v51 = vcombine.high %v2650_v47, %v2658_v9 }
 0x569   :  { %v2667_v54 = vrot.slane %v2659_v49, %v6565_v55  ;;  %v2683_v56 = vrot.slane %v2675_v50, %v6565_v55  ;;  %v2674_v57 = vrot.slane %v2660_v53, %v6565_v55  ;;  %v2690_v0 = vrot.slane %v2676_v51, %v6565_v55 }
 0x56a   :  { %v6221_v51 = vpack.i.bf16 %v6916_v32, %v6914_v30 }
 0x56b   :  { %v2692_v59 = vcombine.high %v2667_v54, %v2683_v56  ;;  %v2691_v60 = vcombine.low %v2667_v54, %v2683_v56  ;;  %v2693_v61 = vcombine.low %v2674_v57, %v2690_v0  ;;  %v2694_v3 = vcombine.high %v2674_v57, %v2690_v0 }
 0x56d   :  { %2699 = vrot.lane.b32.xlu1 %v2692_v59, %s6419_s9 }
 0x571   :  { %2707 = vrot.lane.b32.xlu1 %v2693_v61, %s6432_s29  ;;  %v2841_v61 = vsub.s32 4, %v6498_v1 }
 0x575   :  { %2715 = vrot.lane.b32.xlu1 %v2694_v3, %s6416_s23 }
 0x59c   :  { %v2698_v62 = vpop.permute.xlu0 %2697 }
 0x59d   :  { %v2719_v26 = vsel %vm1126_vm2, %v2623_v35, %v2698_v62  ;;  %v2730_v35 = vrot.slane %v6946_v33, %v2729_v21 }
 0x5a0   :  { %v2706_v17 = vpop.permute.xlu0 %2705 }
 0x5a1   :  { %v2722_v5 = vsel %vm2721_vm4, %v2719_v26, %v2706_v17 }
 0x5a4   :  { %v2714_v6 = vpop.permute.xlu0 %2713 }
 0x5a5   :  { %v2725_v7 = vsel %vm2724_vm5, %v2722_v5, %v2714_v6  ;;  %v2842_v5 = vrot.slane %v6946_v33, %v2841_v61 }
 0x5a6   :  { %6040 = vmatprep.mubr.msk.f32.mxu1 %vm80_vm0, %v2725_v7 }
 0x5df   :  { %v2700_v10 = vpop.permute.xlu1 %2699 }
 0x5e0   :  { %v2720_v34 = vsel %vm1126_vm2, %v2691_v60, %v2700_v10 }
 0x5e3   :  { %v2708_v11 = vpop.permute.xlu1 %2707 }
 0x5e4   :  { %v2723_v12 = vsel %vm2721_vm4, %v2720_v34, %v2708_v11  ;;  %v2849_v11 = vsub.s32 5, %v6498_v1 }
 0x5e7   :  { %v2716_v52 = vpop.permute.xlu1 %2715 }
 0x5e8   :  { %v2726_v14 = vsel %vm2724_vm5, %v2723_v12, %v2716_v52 }
 0x5e9   :  { %6041 = vmatmul.mubr.msk.f32.vlgmr.msra.gmra.mrb[18].mxu1 %vm80_vm0, %v2726_v14  ;;  %v2850_v14 = vrot.slane %v6946_v33, %v2849_v11 }
 0x5ea   :  { %6056 = vmatprep.mubr.msk.f32.mxu1 %vm6428_vm1, %v6426_v28 }
 0x6bc   :  { %v6042_v58 = vpop.f32.mrb[18].mxu1 }
 0x6bd   :  { %v2809_v4 = vadd.f32 %v6042_v58, %v2730_v35  ;;  %v2803_v63 = vpop.f32.mrb[19].mxu1 }
 0x6be   :  { %v2804_v15 = vadd.f32 %v2803_v63, %v2730_v35 }
 0x6bf   :  { %v2813_v27 = vadd.f32 %v6313_v19, %v2809_v4 }
 0x6c0   :  { %v2812_v29 = vadd.f32 %v6314_v38, %v2804_v15 }
 0x6c1   :  { %v2817_v36 = vsel %vm80_vm0, %v2813_v27, 0.0 }
 0x6c2   :  { %2818 = vadd.xlane.f32.xlu1 %v2817_v36  ;;  %v2814_v22 = vsel %vm80_vm0, %v2812_v29, 0.0 }
 0x6c3   :  { %2815 = vadd.xlane.f32.xlu0 %v2814_v22 }
 0x6d3   :  { %6217 = vrot.lane.b32.xlu1 %v6216_v24, %s6425_s27 }
 0x6d7   :  { %209 = vrot.lane.b32.xlu1 %v207_v25, %s6425_s27 }
 0x74f   :  { %v2819_v37 = vpop.xlane.xlu1 %2818 }
 0x750   :  { %v2822_v8 = vmul.f32 0.03125, %v2819_v37  ;;  %v2816_v20 = vpop.xlane.xlu0 %2815 }
 0x751   :  { %v2821_v39 = vmul.f32 0.03125, %v2816_v20 }
 0x752   :  { %v2824_v40 = vsub.f32 %v2813_v27, %v2822_v8 }
 0x753   :  { %v2823_v43 = vsub.f32 %v2812_v29, %v2821_v39  ;;  %v6218_v44 = vpop.permute.xlu1 %6217 }
 0x754   :  { %v6220_v45 = vunpack.i.h.bf16 %v6218_v44  ;;  %v6219_v47 = vunpack.i.l.bf16 %v6218_v44  ;;  %v2826_v9 = vmul.f32 %v2824_v40, %v2824_v40 }
 0x755   :  { %v2825_v16 = vmul.f32 %v2823_v43, %v2823_v43 }
 0x756   :  { %v6172_v48 = vpack.c.bf16 %v6220_v45, %v6219_v47  ;;  %v2830_v18 = vsel %vm80_vm0, %v2826_v9, 0.0 }
 0x757   :  { %v210_v49 = vpop.permute.xlu1 %209  ;;  %2831 = vadd.xlane.f32.xlu0 %v2830_v18  ;;  %v2827_v50 = vsel %vm80_vm0, %v2825_v16, 0.0 }
 0x758   :  { %v212_v13 = vadd.f32 %v210_v49, %v6738_v42  ;;  %6173 = vmatprep.subr.bf16.mxu0 %v6172_v48  ;;  %v213_v53 = vadd.f32 %v6736_v41, %v210_v49 }
 0x759   :  { %6175 = vmatpush3.bf16.msra.mxu0 %v6172_v48 }
 0x75a   :  { %3260 = vrot.lane.b32.xlu1 %v212_v13, %s6423_s25 }
 0x75b   :  { %2828 = vadd.xlane.f32.xlu0 %v2827_v50 }
 0x75e   :  { %3268 = vrot.lane.b32.xlu1 %v212_v13, %s6424_s26 }
 0x762   :  { %3266 = vrot.lane.b32.xlu1 %v213_v53, %s6422_s24 }
 0x766   :  { %3272 = vrot.lane.b32.xlu1 %v212_v13, %s6421_s2 }
 0x771   :  { %6222 = vrot.lane.b32.xlu0 %v6221_v51, %s6425_s27 }
 0x775   :  { %3264 = vrot.lane.b32.xlu0 %v212_v13, %s6422_s24 }
 0x779   :  { %3262 = vrot.lane.b32.xlu0 %v213_v53, %s6423_s25 }
 0x77d   :  { %3270 = vrot.lane.b32.xlu0 %v213_v53, %s6424_s26 }
 0x7cc   :  { %v3261_v42 = vpop.permute.xlu1 %3260 }
 0x7cd   :  { %3276 = vrot.lane.b32.xlu0 %v3261_v42, %s6421_s2 }
 0x7d0   :  { %v3269_v54 = vpop.permute.xlu1 %3268 }
 0x7d1   :  { %3284 = vrot.lane.b32.xlu0 %v3269_v54, %s6421_s2 }
 0x7d4   :  { %v3267_v41 = vpop.permute.xlu1 %3266 }
 0x7d5   :  { %3274 = vrot.lane.b32.xlu0 %v213_v53, %s6421_s2 }
 0x7d8   :  { %v3273_v19 = vpop.permute.xlu1 %3272 }
 0x7d9   :  { %3282 = vrot.lane.b32.xlu0 %v3267_v41, %s6421_s2 }
 0x7e4   :  { %v2832_v30 = vpop.xlane.xlu0 %2831 }
 0x7e5   :  { %v2834_v32 = vmul.f32 0.032258064, %v2832_v30 }
 0x7e7   :  { %v2836_v56 = vadd.f32 1e-12, %v2834_v32 }
 0x7e8   :  { %v2829_v57 = vpop.xlane.xlu0 %2828 }
 0x7e9   :  { %6268 = vrsqrt.f32 %v2836_v56  ;;  %v2833_v0 = vmul.f32 0.032258064, %v2829_v57 }
 0x7eb   :  { %v2835_v59 = vadd.f32 1e-12, %v2833_v0 }
 0x7ec   :  { %v6223_v60 = vpop.permute.xlu0 %6222 }
 0x7ed   :  { %6270 = vrsqrt.f32 %v2835_v59  ;;  %v6225_v3 = vunpack.i.h.bf16 %v6223_v60  ;;  %v6224_v62 = vunpack.i.l.bf16 %v6223_v60 }
 0x7ef   :  { %v6176_v17 = vpack.c.bf16 %v6225_v3, %v6224_v62 }
 0x7f0   :  { %v3265_v26 = vpop.permute.xlu0 %3264 }
 0x7f1   :  { %3280 = vrot.lane.b32.xlu1 %v3265_v26, %s6421_s2  ;;  %6177 = vmatprep.subr.bf16.mxu0 %v6176_v17 }
 0x7f2   :  { %6179 = vmatpush3.bf16.msra.mxu0 %v6176_v17  ;;  %v2952_v17 = vsub.s32 6, %v6498_v1 }
 0x7f3   :  { %v6269_v6 = vpop.eup %6268  ;;  %6059 = vmatprep.subr.mxu0 %v6426_v28 }
 0x7f4   :  { %v3263_v7 = vpop.permute.xlu0 %3262  ;;  %v2844_v10 = vmul.f32 %v6269_v6, %v2842_v5  ;;  %v2953_v26 = vrot.slane %v6946_v33, %v2952_v17 }
 0x7f5   :  { %3278 = vrot.lane.b32.xlu1 %v3263_v7, %s6421_s2 }
 0x7f6   :  { %v2846_v52 = vmul.f32 %v2844_v10, %v2824_v40 }
 0x7f7   :  { %v6271_v34 = vpop.eup %6270 }
 0x7f8   :  { %v2843_v12 = vmul.f32 %v6271_v34, %v2842_v5  ;;  %v6990_v4 = vadd.f32 %v2850_v14, %v2846_v52  ;;  %v3271_v63 = vpop.permute.xlu0 %3270  ;;  %v2958_v34 = vsub.s32 7, %v6498_v1 }
 0x7fa   :  { %v2845_v35 = vmul.f32 %v2843_v12, %v2823_v43  ;;  %v2959_v12 = vrot.slane %v6946_v33, %v2958_v34 }
 0x7fc   :  { %v6988_v58 = vadd.f32 %v2850_v14, %v2845_v35 }
 0x7fe   :  { %6051 = vmatprep.mubr.msk.f32.mxu0 %vm80_vm0, %v6988_v58 }
 0x7ff   :  { %6052 = vmatmul.mubr.msk.f32.vlgmr.msra.gmra.mrb[18].mxu0 %vm80_vm0, %v6990_v4 }
 0x800   :  { %6061 = vmatprep.mubr.msk.f32.mxu0 %vm6428_vm1, %v6426_v28 }
 0x83f   :  { %v3277_v15 = vpop.permute.xlu0 %3276 }
 0x843   :  { %v3285_v27 = vpop.permute.xlu0 %3284 }
 0x844   :  { %v3312_v38 = vcombine.low %v3277_v15, %v3285_v27  ;;  %v3313_v29 = vcombine.high %v3277_v15, %v3285_v27 }
 0x846   :  { %v3320_v23 = vrot.slane %v3312_v38, %v6560_v46  ;;  %v3327_v25 = vrot.slane %v3313_v29, %v6560_v46 }
 0x847   :  { %v3275_v52 = vpop.permute.xlu0 %3274 }
 0x84b   :  { %v3283_v14 = vpop.permute.xlu0 %3282 }
 0x863   :  { %v3281_v36 = vpop.permute.xlu1 %3280 }
 0x864   :  { %v3296_v22 = vcombine.low %v3273_v19, %v3281_v36  ;;  %v3297_v24 = vcombine.high %v3273_v19, %v3281_v36 }
 0x866   :  { %v3304_v37 = vrot.slane %v3296_v22, %v6560_v46  ;;  %v3311_v8 = vrot.slane %v3297_v24, %v6560_v46  ;;  %v3364_v24 = vcombine.low %v3275_v52, %v3283_v14 }
 0x867   :  { %v3279_v35 = vpop.permute.xlu1 %3278 }
 0x868   :  { %v3328_v20 = vcombine.low %v3304_v37, %v3320_v23  ;;  %v3329_v39 = vcombine.high %v3304_v37, %v3320_v23  ;;  %v3344_v40 = vcombine.low %v3311_v8, %v3327_v25  ;;  %v3345_v43 = vcombine.high %v3311_v8, %v3327_v25 }
 0x869   :  { %v3365_v23 = vcombine.high %v3275_v52, %v3283_v14 }
 0x86a   :  { %v3336_v44 = vrot.slane %v3328_v20, %v6565_v55  ;;  %v3343_v45 = vrot.slane %v3329_v39, %v6565_v55  ;;  %v3352_v47 = vrot.slane %v3344_v40, %v6565_v55  ;;  %v3359_v9 = vrot.slane %v3345_v43, %v6565_v55 }
 0x86c   :  { %v3432_v48 = vcombine.low %v3336_v44, %v3343_v45  ;;  %v5802_v18 = vcombine.high %v3336_v44, %v3343_v45  ;;  %v3448_v16 = vcombine.low %v3352_v47, %v3359_v9  ;;  %v5803_v49 = vcombine.high %v3352_v47, %v3359_v9 }
 0x86d   :  { %v3372_v47 = vrot.slane %v3364_v24, %v6560_v46  ;;  %v3379_v9 = vrot.slane %v3365_v23, %v6560_v46 }
 0x86e   :  { %v3439_v13 = vrot.slane %v3432_v48, %v6560_v46  ;;  %v3447_v50 = vrot.slane %v5802_v18, %v6560_v46  ;;  %v3455_v53 = vrot.slane %v3448_v16, %v6560_v46  ;;  %v3463_v51 = vrot.slane %v5803_v49, %v6560_v46 }
 0x870   :  { %v3464_v42 = vcombine.low %v3439_v13, %v3447_v50  ;;  %v3465_v54 = vcombine.high %v3439_v13, %v3447_v50  ;;  %v3480_v41 = vcombine.low %v3455_v53, %v3463_v51  ;;  %v3481_v30 = vcombine.high %v3455_v53, %v3463_v51 }
 0x872   :  { %v3472_v32 = vrot.slane %v3464_v42, %v6565_v55  ;;  %v3488_v56 = vrot.slane %v3480_v41, %v6565_v55  ;;  %v7013_v57 = vrot.slane %v3465_v54, %v6565_v55  ;;  %v7016_v0 = vrot.slane %v3481_v30, %v6565_v55 }
 0x874   :  { %v3496_v59 = vcombine.low %v3472_v32, %v3488_v56  ;;  %v3497_v60 = vcombine.high %v3472_v32, %v3488_v56  ;;  %v3498_v3 = vcombine.low %v7013_v57, %v7016_v0  ;;  %v3499_v62 = vcombine.high %v7013_v57, %v7016_v0 }
 0x876   :  { %6055 = vmatpush3.xpose.msk.msra.mxu1 %vm1126_vm2, %v3496_v59  ;;  %6060 = vmatpush3.xpose.msk.msra.mxu0 %vm1126_vm2, %v3497_v60 }
 0x877   :  { %6064 = vmatprep.subr.mxu1 %v6426_v28  ;;  %6069 = vmatprep.subr.mxu0 %v6426_v28 }
 0x8d2   :  { %v7030_v5 = vpop.f32.mrb[18].mxu0 }
 0x8d3   :  { %v7032_v6 = vpop.f32.mrb[19].mxu0  ;;  %v7038_v10 = vadd.f32 %v7030_v5, %v2953_v26 }
 0x8d4   :  { %v2954_v7 = vadd.f32 %v2953_v26, %v7032_v6 }
 0x8d6   :  { %2974 = vrot.lane.b32.xlu0 %v2954_v7, %s6422_s24  ;;  %2968 = vrot.lane.b32.xlu1 %v2954_v7, %s6423_s25 }
 0x8da   :  { %2970 = vrot.lane.b32.xlu0 %v7038_v10, %s6423_s25  ;;  %2980 = vrot.lane.b32.xlu1 %v2954_v7, %s6424_s26 }
 0x8de   :  { %2982 = vrot.lane.b32.xlu0 %v7038_v10, %s6424_s26  ;;  %3286 = vrot.lane.b32.xlu1 %v3271_v63, %s6421_s2 }
 0x8e2   :  { %2976 = vrot.lane.b32.xlu1 %v7038_v10, %s6422_s24 }
 0x8e6   :  { %2961 = vrot.lane.b32.xlu1 %v2959_v12, %s6421_s2 }
 0x948   :  { %v2975_v15 = vpop.permute.xlu0 %2974  ;;  %v2969_v19 = vpop.permute.xlu1 %2968 }
 0x949   :  { %v2986_v27 = vcombine.low %v2954_v7, %v2975_v15  ;;  %v2987_v38 = vcombine.high %v2954_v7, %v2975_v15 }
 0x94b   :  { %v2994_v25 = vrot.slane %v2986_v27, %v6560_v46  ;;  %v3001_v33 = vrot.slane %v2987_v38, %v6560_v46 }
 0x94c   :  { %v7051_v29 = vpop.permute.xlu0 %2970  ;;  %v2981_v36 = vpop.permute.xlu1 %2980 }
 0x94d   :  { %v3002_v63 = vcombine.low %v2969_v19, %v2981_v36  ;;  %v3003_v22 = vcombine.high %v2969_v19, %v2981_v36 }
 0x94f   :  { %v3010_v37 = vrot.slane %v3002_v63, %v6560_v46  ;;  %v3017_v8 = vrot.slane %v3003_v22, %v6560_v46 }
 0x950   :  { %v3287_v20 = vpop.permute.xlu1 %3286  ;;  %v2983_v45 = vpop.permute.xlu0 %2982 }
 0x951   :  { %v3018_v39 = vcombine.low %v2994_v25, %v3010_v37  ;;  %v3019_v40 = vcombine.high %v2994_v25, %v3010_v37  ;;  %v3034_v43 = vcombine.low %v3001_v33, %v3017_v8  ;;  %v3035_v44 = vcombine.high %v3001_v33, %v3017_v8 }
 0x952   :  { %v3380_v48 = vcombine.low %v3279_v35, %v3287_v20  ;;  %v3381_v18 = vcombine.high %v3279_v35, %v3287_v20  ;;  %v3070_v53 = vcombine.low %v7051_v29, %v2983_v45  ;;  %v3071_v51 = vcombine.high %v7051_v29, %v2983_v45 }
 0x953   :  { %v3026_v16 = vrot.slane %v3018_v39, %v6565_v55  ;;  %v3033_v49 = vrot.slane %v3019_v40, %v6565_v55  ;;  %v3042_v13 = vrot.slane %v3034_v43, %v6565_v55  ;;  %v3049_v50 = vrot.slane %v3035_v44, %v6565_v55 }
 0x954   :  { %v3388_v42 = vrot.slane %v3380_v48, %v6560_v46  ;;  %v3395_v54 = vrot.slane %v3381_v18, %v6560_v46  ;;  %v2977_v41 = vpop.permute.xlu1 %2976  ;;  %v3078_v24 = vrot.slane %v3070_v53, %v6560_v46 }
 0x955   :  { %v3122_v30 = vcombine.low %v3026_v16, %v3033_v49  ;;  %v5798_v32 = vcombine.high %v3026_v16, %v3033_v49  ;;  %v3138_v56 = vcombine.low %v3042_v13, %v3049_v50  ;;  %v5799_v59 = vcombine.high %v3042_v13, %v3049_v50 }
 0x956   :  { %v3396_v60 = vcombine.low %v3372_v47, %v3388_v42  ;;  %v3397_v26 = vcombine.high %v3372_v47, %v3388_v42  ;;  %v3412_v7 = vcombine.low %v3379_v9, %v3395_v54  ;;  %v3413_v34 = vcombine.high %v3379_v9, %v3395_v54 }
 0x957   :  { %v3129_v12 = vrot.slane %v3122_v30, %v6560_v46  ;;  %v3137_v52 = vrot.slane %v5798_v32, %v6560_v46  ;;  %v3145_v14 = vrot.slane %v3138_v56, %v6560_v46  ;;  %v3153_v35 = vrot.slane %v5799_v59, %v6560_v46 }
 0x958   :  { %v3404_v15 = vrot.slane %v3396_v60, %v6565_v55  ;;  %v3411_v19 = vrot.slane %v3397_v26, %v6565_v55  ;;  %v3420_v27 = vrot.slane %v3412_v7, %v6565_v55  ;;  %v3427_v38 = vrot.slane %v3413_v34, %v6565_v55  ;;  %v2962_v29 = vpop.permute.xlu1 %2961 }
 0x959   :  { %v3154_v36 = vcombine.low %v3129_v12, %v3137_v52  ;;  %v3155_v63 = vcombine.high %v3129_v12, %v3137_v52  ;;  %v3170_v22 = vcombine.low %v3145_v14, %v3153_v35  ;;  %v3171_v8 = vcombine.high %v3145_v14, %v3153_v35 }
 0x95a   :  { %v3500_v23 = vcombine.low %v3404_v15, %v3411_v19  ;;  %v5804_v25 = vcombine.high %v3404_v15, %v3411_v19  ;;  %v3516_v33 = vcombine.low %v3420_v27, %v3427_v38  ;;  %v5805_v37 = vcombine.high %v3420_v27, %v3427_v38 }
 0x95b   :  { %v3054_v20 = vcombine.low %v7038_v10, %v2977_v41  ;;  %v3055_v39 = vcombine.high %v7038_v10, %v2977_v41  ;;  %v7079_v40 = vadd.f32 %v7030_v5, %v2962_v29  ;;  %v3085_v9 = vrot.slane %v3071_v51, %v6560_v46 }
 0x95c   :  { %v3507_v43 = vrot.slane %v3500_v23, %v6560_v46  ;;  %v3515_v44 = vrot.slane %v5804_v25, %v6560_v46  ;;  %v3523_v45 = vrot.slane %v3516_v33, %v6560_v46  ;;  %v3531_v47 = vrot.slane %v5805_v37, %v6560_v46 }
 0x95d   :  { %v3062_v48 = vrot.slane %v3054_v20, %v6560_v46  ;;  %v3069_v18 = vrot.slane %v3055_v39, %v6560_v46  ;;  %3576 = vrot.lane.b32.xlu0 %v7079_v40, %s6422_s24  ;;  %3572 = vrot.lane.b32.xlu1 %v7079_v40, %s6423_s25  ;;  %v7093_v10 = vadd.f32 %v2962_v29, %v7032_v6 }
 0x95e   :  { %v3532_v5 = vcombine.low %v3507_v43, %v3515_v44  ;;  %v3162_v16 = vrot.slane %v3154_v36, %v6565_v55  ;;  %v3548_v51 = vcombine.low %v3523_v45, %v3531_v47  ;;  %v3178_v42 = vrot.slane %v3170_v22, %v6565_v55 }
 0x95f   :  { %v3086_v49 = vcombine.low %v3062_v48, %v3078_v24  ;;  %v3087_v13 = vcombine.high %v3062_v48, %v3078_v24  ;;  %v3102_v50 = vcombine.low %v3069_v18, %v3085_v9  ;;  %v3103_v53 = vcombine.high %v3069_v18, %v3085_v9 }
 0x960   :  { %v3169_v54 = vrot.slane %v3155_v63, %v6565_v55  ;;  %v3185_v41 = vrot.slane %v3171_v8, %v6565_v55  ;;  %v3533_v59 = vcombine.high %v3507_v43, %v3515_v44  ;;  %v3186_v60 = vcombine.low %v3162_v16, %v3178_v42 }
 0x961   :  { %v3094_v30 = vrot.slane %v3086_v49, %v6565_v55  ;;  %v3101_v32 = vrot.slane %v3087_v13, %v6565_v55  ;;  %v3110_v6 = vrot.slane %v3102_v50, %v6565_v55  ;;  %v3117_v56 = vrot.slane %v3103_v53, %v6565_v55  ;;  %3580 = vrot.lane.b32.xlu1 %v7079_v40, %s6424_s26 }
 0x962   :  { %v3187_v26 = vcombine.high %v3162_v16, %v3178_v42  ;;  %3574 = vrot.lane.b32.xlu0 %v7093_v10, %s6422_s24  ;;  %v3540_v7 = vrot.slane %v3532_v5, %v6565_v55  ;;  %v3549_v35 = vcombine.high %v3523_v45, %v3531_v47  ;;  %6057 = vmatmul.mubr.msk.f32.vlgmr.msra.gmra.mrb[20].mxu1 %vm1126_vm2, %v3186_v60 }
 0x963   :  { %v3190_v34 = vcombine.low %v3094_v30, %v3101_v32  ;;  %v5800_v12 = vcombine.high %v3094_v30, %v3101_v32  ;;  %v3206_v52 = vcombine.low %v3110_v6, %v3117_v56  ;;  %v5801_v14 = vcombine.high %v3110_v6, %v3117_v56  ;;  %6065 = vmatpush3.xpose.msk.msra.mxu1 %vm1126_vm2, %v3498_v3 }
 0x964   :  { %6062 = vmatmul.mubr.msk.f32.vlgmr.msra.gmra.mrb[20].mxu0 %vm1126_vm2, %v3187_v26  ;;  %v3188_v15 = vcombine.low %v3169_v54, %v3185_v41  ;;  %v3556_v19 = vrot.slane %v3548_v51, %v6565_v55  ;;  %6066 = vmatprep.mubr.msk.f32.mxu1 %vm6428_vm1, %v6426_v28  ;;  %v3189_v63 = vcombine.high %v3169_v54, %v3185_v41 }
 0x965   :  { %v3197_v27 = vrot.slane %v3190_v34, %v6560_v46  ;;  %v3205_v38 = vrot.slane %v5800_v12, %v6560_v46  ;;  %v3213_v29 = vrot.slane %v3206_v52, %v6560_v46  ;;  %v3221_v36 = vrot.slane %v5801_v14, %v6560_v46  ;;  %6070 = vmatpush3.xpose.msk.msra.mxu0 %vm1126_vm2, %v3499_v62 }
 0x966   :  { %v3564_v22 = vcombine.low %v3540_v7, %v3556_v19  ;;  %v3565_v24 = vcombine.high %v3540_v7, %v3556_v19  ;;  %6071 = vmatprep.mubr.msk.f32.mxu0 %vm6428_vm1, %v6426_v28  ;;  %6074 = vmatprep.subr.mxu1 %v6426_v28  ;;  %v3547_v57 = vrot.slane %v3533_v59, %v6565_v55 }
 0x967   :  { %v3222_v23 = vcombine.low %v3197_v27, %v3205_v38  ;;  %v3223_v25 = vcombine.high %v3197_v27, %v3205_v38  ;;  %v3238_v33 = vcombine.low %v3213_v29, %v3221_v36  ;;  %v3239_v37 = vcombine.high %v3213_v29, %v3221_v36  ;;  %6079 = vmatprep.subr.mxu0 %v6426_v28 }
 0x968   :  { %v3563_v0 = vrot.slane %v3549_v35, %v6565_v55  ;;  %6067 = vmatmul.mubr.msk.f32.vlgmr.msra.gmra.mrb[22].mxu1 %vm1126_vm2, %v3188_v15  ;;  %6072 = vmatmul.mubr.msk.f32.vlgmr.msra.gmra.mrb[22].mxu0 %vm1126_vm2, %v3189_v63 }
 0x969   :  { %v3230_v3 = vrot.slane %v3222_v23, %v6565_v55  ;;  %v3246_v62 = vrot.slane %v3238_v33, %v6565_v55  ;;  %6075 = vmatpush3.xpose.msk.msra.mxu1 %vm1126_vm2, %v3564_v22  ;;  %6080 = vmatpush3.xpose.msk.msra.mxu0 %vm1126_vm2, %v3565_v24  ;;  %v3237_v8 = vrot.slane %v3223_v25, %v6565_v55 }
 0x96a   :  { %3570 = vrot.lane.b32.xlu1 %v7093_v10, %s6423_s25  ;;  %6076 = vmatprep.mubr.msk.f32.mxu1 %vm6428_vm1, %v6426_v28  ;;  %v3253_v43 = vrot.slane %v3239_v37, %v6565_v55  ;;  %v3566_v44 = vcombine.low %v3547_v57, %v3563_v0  ;;  %v3567_v45 = vcombine.high %v3547_v57, %v3563_v0 }
 0x96b   :  { %v3254_v20 = vcombine.low %v3230_v3, %v3246_v62  ;;  %v3255_v39 = vcombine.high %v3230_v3, %v3246_v62  ;;  %6081 = vmatprep.mubr.msk.f32.mxu0 %vm6428_vm1, %v6426_v28  ;;  %6084 = vmatprep.subr.mxu1 %v6426_v28 }
 0x96c   :  { %6089 = vmatprep.subr.mxu0 %v6426_v28  ;;  %v3256_v47 = vcombine.low %v3237_v8, %v3253_v43  ;;  %v3257_v9 = vcombine.high %v3237_v8, %v3253_v43 }
 0x96d   :  { %6077 = vmatmul.mubr.msk.f32.vlgmr.msra.gmra.mrb[24].mxu1 %vm1126_vm2, %v3254_v20  ;;  %6082 = vmatmul.mubr.msk.f32.vlgmr.msra.gmra.mrb[24].mxu0 %vm1126_vm2, %v3255_v39 }
 0x96e   :  { %6085 = vmatpush3.xpose.msk.msra.mxu1 %vm1126_vm2, %v3566_v44  ;;  %6090 = vmatpush3.xpose.msk.msra.mxu0 %vm1126_vm2, %v3567_v45 }
 0x96f   :  { %3578 = vrot.lane.b32.xlu1 %v7093_v10, %s6424_s26  ;;  %6086 = vmatprep.mubr.msk.f32.mxu1 %vm6428_vm1, %v6426_v28 }
 0x970   :  { %6091 = vmatprep.mubr.msk.f32.mxu0 %vm6428_vm1, %v6426_v28  ;;  %6094 = vmatprep.subr.mxu1 %v6426_v28 }
 0x971   :  { %6087 = vmatmul.mubr.msk.f32.vlgmr.msra.gmra.mrb[26].mxu1 %vm1126_vm2, %v3256_v47  ;;  %6092 = vmatmul.mubr.msk.f32.vlgmr.msra.gmra.mrb[26].mxu0 %vm1126_vm2, %v3257_v9 }
 0x972   :  { %6099 = vmatprep.subr.mxu0 %v6426_v28  ;;  %6096 = vmatprep.mubr.msk.f32.mxu1 %vm6428_vm1, %v6426_v28 }
 0x973   :  { %3582 = vrot.lane.b32.xlu1 %v7093_v10, %s6425_s27  ;;  %6101 = vmatprep.mubr.msk.f32.mxu0 %vm6428_vm1, %v6426_v28 }
 0x9cf   :  { %v7174_v36 = vpop.permute.xlu1 %3572  ;;  %v7179_v24 = vpop.permute.xlu0 %3576 }
 0x9d3   :  { %v7177_v22 = vpop.permute.xlu1 %3580 }
 0x9d4   :  { %v3575_v25 = vpop.permute.xlu0 %3574 }
 0x9dc   :  { %v3571_v23 = vpop.permute.xlu1 %3570 }
 0x9e1   :  { %v3579_v33 = vpop.permute.xlu1 %3578 }
 0x9e5   :  { %v3583_v37 = vpop.permute.xlu1 %3582 }
 0xa35   :  { %v3950_v48 = vpop.f32.mrb[20].mxu1 }
 0xa36   :  { %v4486_v5 = vmul.f32 0.35355338, %v3950_v48  ;;  %v6058_v49 = vpop.f32.mrb[21].mxu1 }
 0xa37   :  { %v4026_v18 = vpop.f32.mrb[20].mxu0 }
 0xa38   :  { %v4487_v16 = vmul.f32 0.35355338, %v4026_v18  ;;  %v6063_v13 = vpop.f32.mrb[21].mxu0  ;;  %v4494_v50 = vsel %vm1126_vm2, %v4486_v5, -inf }
 0xa39   :  { %4495 = vmax.xlane.f32.xlu0 %v4494_v50 }
 0xa3a   :  { %v4497_v53 = vsel %vm1126_vm2, %v4487_v16, -inf }
 0xa3b   :  { %4498 = vmax.xlane.f32.xlu1 %v4497_v53  ;;  %v4102_v51 = vpop.f32.mrb[22].mxu1  ;;  %v4178_v10 = vpop.f32.mrb[22].mxu0 }
 0xa3c   :  { %v4488_v42 = vmul.f32 0.35355338, %v4102_v51  ;;  %v6068_v54 = vpop.f32.mrb[23].mxu1  ;;  %v6073_v41 = vpop.f32.mrb[23].mxu0  ;;  %v4489_v30 = vmul.f32 0.35355338, %v4178_v10 }
 0xa3e   :  { %v4500_v32 = vsel %vm1126_vm2, %v4488_v42, -inf  ;;  %v4503_v34 = vsel %vm1126_vm2, %v4489_v30, -inf }
 0xa3f   :  { %4501 = vmax.xlane.f32.xlu0 %v4500_v32 }
 0xa40   :  { %v4254_v6 = vpop.f32.mrb[24].mxu1  ;;  %v4330_v59 = vpop.f32.mrb[24].mxu0 }
 0xa41   :  { %v4490_v56 = vmul.f32 0.35355338, %v4254_v6  ;;  %v6078_v60 = vpop.f32.mrb[25].mxu1  ;;  %v6083_v26 = vpop.f32.mrb[25].mxu0  ;;  %v4491_v7 = vmul.f32 0.35355338, %v4330_v59 }
 0xa43   :  { %v4506_v12 = vsel %vm1126_vm2, %v4490_v56, -inf  ;;  %4504 = vmax.xlane.f32.xlu0 %v4503_v34  ;;  %v4509_v38 = vsel %vm1126_vm2, %v4491_v7, -inf }
 0xa44   :  { %v4406_v52 = vpop.f32.mrb[26].mxu1  ;;  %4507 = vmax.xlane.f32.xlu1 %v4506_v12  ;;  %v4482_v35 = vpop.f32.mrb[26].mxu0 }
 0xa45   :  { %v4492_v14 = vmul.f32 0.35355338, %v4406_v52  ;;  %v6088_v15 = vpop.f32.mrb[27].mxu1  ;;  %v6093_v19 = vpop.f32.mrb[27].mxu0  ;;  %v4493_v27 = vmul.f32 0.35355338, %v4482_v35 }
 0xa47   :  { %v4512_v29 = vsel %vm1126_vm2, %v4492_v14, -inf  ;;  %4510 = vmax.xlane.f32.xlu0 %v4509_v38  ;;  %v4515_v63 = vsel %vm1126_vm2, %v4493_v27, -inf }
 0xa48   :  { %4513 = vmax.xlane.f32.xlu1 %v4512_v29 }
 0xa4b   :  { %4516 = vmax.xlane.f32.xlu0 %v4515_v63 }
 0xa59   :  { %3590 = vrot.lane.b32.xlu1 %v3575_v25, %s6425_s27 }
 0xa5d   :  { %3594 = vrot.lane.b32.xlu1 %v3579_v33, %s6425_s27 }
 0xa61   :  { %3584 = vrot.lane.b32.xlu1 %v7079_v40, %s6425_s27  ;;  %3586 = vrot.lane.b32.xlu0 %v3571_v23, %s6425_s27 }
 0xac6   :  { %v4496_v57 = vpop.xlane.xlu0 %4495 }
 0xac7   :  { %v4518_v3 = vsub.f32 %v4486_v5, %v4496_v57 }
 0xac8   :  { %v4499_v0 = vpop.xlane.xlu1 %4498 }
 0xac9   :  { %v4519_v62 = vsub.f32 %v4487_v16, %v4499_v0  ;;  %v4526_v8 = vmul.f32 1.442695, %v4518_v3 }
 0xacb   :  { %v4528_v20 = vmul.f32 1.442695, %v4519_v62  ;;  %6272 = vpow2.f32 %v4526_v8 }
 0xacc   :  { %v4502_v39 = vpop.xlane.xlu0 %4501 }
 0xacd   :  { %6274 = vpow2.f32 %v4528_v20  ;;  %v4520_v43 = vsub.f32 %v4488_v42, %v4502_v39 }
 0xacf   :  { %v4530_v44 = vmul.f32 1.442695, %v4520_v43 }
 0xad0   :  { %v4505_v45 = vpop.xlane.xlu0 %4504 }
 0xad1   :  { %v4508_v47 = vpop.xlane.xlu1 %4507  ;;  %6276 = vpow2.f32 %v4530_v44  ;;  %v4521_v9 = vsub.f32 %v4489_v30, %v4505_v45 }
 0xad2   :  { %v4522_v48 = vsub.f32 %v4490_v56, %v4508_v47 }
 0xad3   :  { %v4532_v40 = vmul.f32 1.442695, %v4521_v9 }
 0xad4   :  { %v4534_v18 = vmul.f32 1.442695, %v4522_v48  ;;  %v4511_v49 = vpop.xlane.xlu0 %4510 }
 0xad5   :  { %v4514_v13 = vpop.xlane.xlu1 %4513  ;;  %6278 = vpow2.f32 %v4532_v40  ;;  %v4523_v50 = vsub.f32 %v4491_v7, %v4511_v49  ;;  %v7186_v16 = vpop.eup %6272 }
 0xad6   :  { %v4524_v5 = vsub.f32 %v4492_v14, %v4514_v13  ;;  %6280 = vpow2.f32 %v4534_v18  ;;  %v4542_v42 = vsel %vm1126_vm2, %v7186_v16, 0.0 }
 0xad7   :  { %v7188_v53 = vpop.eup %6274  ;;  %v4536_v51 = vmul.f32 1.442695, %v4523_v50  ;;  %4543 = vadd.xlane.f32.xlu0 %v4542_v42 }
 0xad8   :  { %v4538_v10 = vmul.f32 1.442695, %v4524_v5  ;;  %v4517_v54 = vpop.xlane.xlu0 %4516  ;;  %v4545_v30 = vsel %vm1126_vm2, %v7188_v53, 0.0 }
 0xad9   :  { %v3591_v41 = vpop.permute.xlu1 %3590  ;;  %6282 = vpow2.f32 %v4536_v51  ;;  %v4525_v32 = vsub.f32 %v4493_v27, %v4517_v54  ;;  %4546 = vadd.xlane.f32.xlu1 %v4545_v30 }
 0xada   :  { %v3606_v6 = vcombine.low %v3583_v37, %v3591_v41  ;;  %6284 = vpow2.f32 %v4538_v10  ;;  %v3607_v60 = vcombine.high %v3583_v37, %v3591_v41 }
 0xadb   :  { %v7194_v56 = vpop.eup %6276  ;;  %v4540_v59 = vmul.f32 1.442695, %v4525_v32 }
 0xadc   :  { %v3587_v26 = vpop.permute.xlu0 %3586  ;;  %v4548_v34 = vsel %vm1126_vm2, %v7194_v56, 0.0  ;;  %v3614_v14 = vrot.slane %v3606_v6, %v6560_v46  ;;  %v3621_v15 = vrot.slane %v3607_v60, %v6560_v46 }
 0xadd   :  { %v3595_v7 = vpop.permute.xlu1 %3594  ;;  %4549 = vadd.xlane.f32.xlu0 %v4548_v34  ;;  %6286 = vpow2.f32 %v4540_v59 }
 0xade   :  { %v3622_v12 = vcombine.low %v3587_v26, %v3595_v7  ;;  %v3623_v52 = vcombine.high %v3587_v26, %v3595_v7 }
 0xadf   :  { %v7199_v35 = vpop.eup %6278 }
 0xae0   :  { %v3630_v19 = vrot.slane %v3622_v12, %v6560_v46  ;;  %v3637_v27 = vrot.slane %v3623_v52, %v6560_v46  ;;  %v4551_v38 = vsel %vm1126_vm2, %v7199_v35, 0.0  ;;  %v7206_v29 = vpop.eup %6280 }
 0xae1   :  { %4552 = vadd.xlane.f32.xlu0 %v4551_v38  ;;  %v4554_v20 = vsel %vm1126_vm2, %v7206_v29, 0.0  ;;  %v3585_v7 = vpop.permute.xlu1 %3584 }
 0xae2   :  { %v3638_v63 = vcombine.low %v3614_v14, %v3630_v19  ;;  %v3639_v23 = vcombine.high %v3614_v14, %v3630_v19  ;;  %v3654_v25 = vcombine.low %v3621_v15, %v3637_v27  ;;  %v3655_v33 = vcombine.high %v3621_v15, %v3637_v27 }
 0xae3   :  { %v7208_v37 = vpop.eup %6282 }
 0xae4   :  { %v3646_v57 = vrot.slane %v3638_v63, %v6565_v55  ;;  %v3653_v0 = vrot.slane %v3639_v23, %v6565_v55  ;;  %v3662_v3 = vrot.slane %v3654_v25, %v6565_v55  ;;  %v3669_v62 = vrot.slane %v3655_v33, %v6565_v55  ;;  %v7218_v39 = vpop.eup %6284 }
 0xae5   :  { %v4557_v8 = vsel %vm1126_vm2, %v7208_v37, 0.0  ;;  %4555 = vadd.xlane.f32.xlu0 %v4554_v20  ;;  %v4560_v49 = vsel %vm1126_vm2, %v7218_v39, 0.0 }
 0xae6   :  { %v3742_v43 = vcombine.low %v3646_v57, %v3653_v0  ;;  %v5806_v44 = vcombine.high %v3646_v57, %v3653_v0  ;;  %v3758_v45 = vcombine.low %v3662_v3, %v3669_v62  ;;  %v5807_v47 = vcombine.high %v3662_v3, %v3669_v62  ;;  %4558 = vadd.xlane.f32.xlu1 %v4557_v8 }
 0xae7   :  { %v7226_v13 = vpop.eup %6286 }
 0xae8   :  { %v3749_v9 = vrot.slane %v3742_v43, %v6560_v46  ;;  %v3757_v48 = vrot.slane %v5806_v44, %v6560_v46  ;;  %v3765_v40 = vrot.slane %v3758_v45, %v6560_v46  ;;  %v3773_v18 = vrot.slane %v5807_v47, %v6560_v46 }
 0xae9   :  { %4561 = vadd.xlane.f32.xlu0 %v4560_v49  ;;  %v4563_v32 = vsel %vm1126_vm2, %v7226_v13, 0.0 }
 0xaea   :  { %v3774_v50 = vcombine.low %v3749_v9, %v3757_v48  ;;  %v3790_v5 = vcombine.low %v3765_v40, %v3773_v18  ;;  %v3775_v51 = vcombine.high %v3749_v9, %v3757_v48  ;;  %v3791_v10 = vcombine.high %v3765_v40, %v3773_v18 }
 0xaec   :  { %v3782_v42 = vrot.slane %v3774_v50, %v6565_v55  ;;  %v3798_v54 = vrot.slane %v3790_v5, %v6565_v55  ;;  %v3789_v41 = vrot.slane %v3775_v51, %v6565_v55  ;;  %v3805_v30 = vrot.slane %v3791_v10, %v6565_v55 }
 0xaed   :  { %4564 = vadd.xlane.f32.xlu0 %v4563_v32 }
 0xaee   :  { %v3806_v6 = vcombine.low %v3782_v42, %v3798_v54  ;;  %v3807_v59 = vcombine.high %v3782_v42, %v3798_v54  ;;  %v3808_v60 = vcombine.low %v3789_v41, %v3805_v30  ;;  %v3809_v26 = vcombine.high %v3789_v41, %v3805_v30 }
 0xaf0   :  { %6095 = vmatpush3.msra.mxu1 %v3806_v6  ;;  %6100 = vmatpush3.msra.mxu0 %v3807_v59 }
 0xaf1   :  { %6104 = vmatprep.subr.mxu1 %v6426_v28  ;;  %6109 = vmatprep.subr.mxu0 %v6426_v28 }
 0xaf7   :  { %3592 = vrot.lane.b32.xlu1 %v7179_v24, %s6425_s27 }
 0xafb   :  { %3596 = vrot.lane.b32.xlu1 %v7177_v22, %s6425_s27 }
 0xb03   :  { %3588 = vrot.lane.b32.xlu0 %v7174_v36, %s6425_s27 }
 0xb64   :  { %v4544_v34 = vpop.xlane.xlu0 %4543 }
 0xb65   :  { %6288 = vrcp.f32 %v4544_v34 }
 0xb66   :  { %v4547_v12 = vpop.xlane.xlu1 %4546 }
 0xb67   :  { %6290 = vrcp.f32 %v4547_v12 }
 0xb6a   :  { %v4550_v52 = vpop.xlane.xlu0 %4549 }
 0xb6b   :  { %6292 = vrcp.f32 %v4550_v52 }
 0xb6e   :  { %v4553_v14 = vpop.xlane.xlu0 %4552 }
 0xb6f   :  { %6294 = vrcp.f32 %v4553_v14  ;;  %v6289_v15 = vpop.eup %6288 }
 0xb70   :  { %v4574_v27 = vmul.f32 %v6289_v15, %v7186_v16 }
 0xb71   :  { %v6291_v19 = vpop.eup %6290 }
 0xb72   :  { %v4575_v24 = vmul.f32 %v6291_v19, %v7188_v53  ;;  %v4556_v38 = vpop.xlane.xlu0 %4555  ;;  %6097 = vmatmul.mubr.msk.f32.vlgmr.msra.gmra.mrb[28].mxu1 %vm1126_vm2, %v4574_v27 }
 0xb73   :  { %v4559_v22 = vpop.xlane.xlu1 %4558  ;;  %6105 = vmatpush3.msra.mxu1 %v3808_v60  ;;  %6106 = vmatprep.mubr.msk.f32.mxu1 %vm6428_vm1, %v6426_v28 }
 0xb74   :  { %6102 = vmatmul.mubr.msk.f32.vlgmr.msra.gmra.mrb[28].mxu0 %vm1126_vm2, %v4575_v24  ;;  %6114 = vmatprep.subr.mxu1 %v6426_v28  ;;  %6296 = vrcp.f32 %v4559_v22 }
 0xb75   :  { %v6293_v36 = vpop.eup %6292  ;;  %6110 = vmatpush3.msra.mxu0 %v3809_v26  ;;  %6111 = vmatprep.mubr.msk.f32.mxu0 %vm6428_vm1, %v6426_v28  ;;  %6298 = vrcp.f32 %v4556_v38 }
 0xb76   :  { %v4576_v63 = vmul.f32 %v6293_v36, %v7194_v56  ;;  %v4562_v16 = vpop.xlane.xlu0 %4561  ;;  %6119 = vmatprep.subr.mxu0 %v6426_v28 }
 0xb77   :  { %v3593_v23 = vpop.permute.xlu1 %3592  ;;  %6300 = vrcp.f32 %v4562_v16 }
 0xb78   :  { %6107 = vmatmul.mubr.msk.f32.vlgmr.msra.gmra.mrb[30].mxu1 %vm1126_vm2, %v4576_v63  ;;  %v3674_v56 = vcombine.low %v3585_v7, %v3593_v23  ;;  %v3675_v57 = vcombine.high %v3585_v7, %v3593_v23 }
 0xb79   :  { %v6295_v53 = vpop.eup %6294  ;;  %6116 = vmatprep.mubr.msk.f32.mxu1 %vm6428_vm1, %v6426_v28 }
 0xb7a   :  { %v4577_v25 = vmul.f32 %v6295_v53, %v7199_v35  ;;  %v4565_v33 = vpop.xlane.xlu0 %4564  ;;  %v3682_v20 = vrot.slane %v3674_v56, %v6560_v46  ;;  %v3689_v43 = vrot.slane %v3675_v57, %v6560_v46 }
 0xb7b   :  { %v3597_v0 = vpop.permute.xlu1 %3596  ;;  %6302 = vrcp.f32 %v4565_v33  ;;  %v6318_v33 = vld [vmem:[#allocation5 + $0x50] sm:$0xff] }
 0xb7c   :  { %6112 = vmatmul.mubr.msk.f32.vlgmr.msra.gmra.mrb[30].mxu0 %vm1126_vm2, %v4577_v25 }
 0xb7d   :  { %6121 = vmatprep.mubr.msk.f32.mxu0 %vm6428_vm1, %v6426_v28 }
 0xb7e   :  { %v3589_v3 = vpop.permute.xlu0 %3588  ;;  %v6297_v6 = vpop.eup %6296 }
 0xb7f   :  { %v3690_v62 = vcombine.low %v3589_v3, %v3597_v0  ;;  %v3691_v8 = vcombine.high %v3589_v3, %v3597_v0  ;;  %v6299_v34 = vpop.eup %6298  ;;  %v4579_v36 = vmul.f32 %v6297_v6, %v7208_v37  ;;  %v6316_v37 = vld [vmem:[#allocation5 + $0x20] sm:$0xff] }
 0xb80   :  { %v4578_v22 = vmul.f32 %v6299_v34, %v7206_v29  ;;  %v6315_v29 = vld [vmem:[#allocation5 + $0x8] sm:$0xff] }
 0xb81   :  { %v3698_v44 = vrot.slane %v3690_v62, %v6560_v46  ;;  %v3705_v35 = vrot.slane %v3691_v8, %v6560_v46  ;;  %v6301_v14 = vpop.eup %6300  ;;  %v6226_v25 = vpack.i.bf16 %v6316_v37, %v6315_v29 }
 0xb82   :  { %v4580_v53 = vmul.f32 %v6301_v14, %v7218_v39  ;;  %v6317_v39 = vld [vmem:[#allocation5 + $0x38] sm:$0xff] }
 0xb83   :  { %v3706_v45 = vcombine.low %v3682_v20, %v3698_v44  ;;  %v3707_v47 = vcombine.high %v3682_v20, %v3698_v44  ;;  %v3722_v9 = vcombine.low %v3689_v43, %v3705_v35  ;;  %v3723_v48 = vcombine.high %v3689_v43, %v3705_v35  ;;  %6227 = vrot.lane.b32.xlu0 %v6226_v25, %s6421_s2 }
 0xb85   :  { %v3714_v40 = vrot.slane %v3706_v45, %v6565_v55  ;;  %v3721_v18 = vrot.slane %v3707_v47, %v6565_v55  ;;  %v3730_v49 = vrot.slane %v3722_v9, %v6565_v55  ;;  %v3737_v50 = vrot.slane %v3723_v48, %v6565_v55  ;;  %v6303_v38 = vpop.eup %6302 }
 0xb86   :  { %v4581_v23 = vmul.f32 %v6303_v38, %v7226_v13  ;;  %v6231_v13 = vpack.i.bf16 %v6318_v33, %v6317_v39 }
 0xb87   :  { %v3810_v5 = vcombine.low %v3714_v40, %v3721_v18  ;;  %v5808_v51 = vcombine.high %v3714_v40, %v3721_v18  ;;  %v3826_v10 = vcombine.low %v3730_v49, %v3737_v50  ;;  %v5809_v42 = vcombine.high %v3730_v49, %v3737_v50 }
 0xb88   :  { %6232 = vrot.lane.b32.xlu1 %v6231_v13, %s6421_s2 }
 0xb89   :  { %v3817_v54 = vrot.slane %v3810_v5, %v6560_v46  ;;  %v3825_v41 = vrot.slane %v5808_v51, %v6560_v46  ;;  %v3833_v30 = vrot.slane %v3826_v10, %v6560_v46  ;;  %v3841_v32 = vrot.slane %v5809_v42, %v6560_v46 }
 0xb8b   :  { %v3842_v59 = vcombine.low %v3817_v54, %v3825_v41  ;;  %v3858_v60 = vcombine.low %v3833_v30, %v3841_v32  ;;  %v3843_v26 = vcombine.high %v3817_v54, %v3825_v41  ;;  %v3859_v7 = vcombine.high %v3833_v30, %v3841_v32 }
 0xb8d   :  { %v3850_v12 = vrot.slane %v3842_v59, %v6565_v55  ;;  %v3866_v52 = vrot.slane %v3858_v60, %v6565_v55  ;;  %v3857_v15 = vrot.slane %v3843_v26, %v6565_v55  ;;  %v3873_v19 = vrot.slane %v3859_v7, %v6565_v55 }
 0xb8f   :  { %v3874_v27 = vcombine.low %v3850_v12, %v3866_v52  ;;  %v3875_v24 = vcombine.high %v3850_v12, %v3866_v52  ;;  %v3876_v63 = vcombine.low %v3857_v15, %v3873_v19  ;;  %v3877_v16 = vcombine.high %v3857_v15, %v3873_v19 }
 0xb91   :  { %6115 = vmatpush3.msra.mxu1 %v3874_v27  ;;  %6120 = vmatpush3.msra.mxu0 %v3875_v24 }
 0xb92   :  { %6117 = vmatmul.mubr.msk.f32.vlgmr.msra.gmra.mrb[32].mxu1 %vm1126_vm2, %v4578_v22  ;;  %6122 = vmatmul.mubr.msk.f32.vlgmr.msra.gmra.mrb[32].mxu0 %vm1126_vm2, %v4579_v36 }
 0xb93   :  { %6124 = vmatprep.subr.mxu1 %v6426_v28  ;;  %6129 = vmatprep.subr.mxu0 %v6426_v28 }
 0xb94   :  { %6125 = vmatpush3.msra.mxu1 %v3876_v63  ;;  %6130 = vmatpush3.msra.mxu0 %v3877_v16 }
 0xb95   :  { %6126 = vmatprep.mubr.msk.f32.mxu1 %vm6428_vm1, %v6426_v28  ;;  %6131 = vmatprep.mubr.msk.f32.mxu0 %vm6428_vm1, %v6426_v28 }
 0xb96   :  { %6127 = vmatmul.mubr.msk.f32.vlgmr.msra.gmra.mrb[34].mxu1 %vm1126_vm2, %v4580_v53  ;;  %6132 = vmatmul.mubr.msk.f32.vlgmr.msra.gmra.mrb[34].mxu0 %vm1126_vm2, %v4581_v23 }
 0xbf5   :  { %v6228_v43 = vpop.permute.xlu0 %6227 }
 0xbf6   :  { %v6230_v44 = vunpack.i.h.bf16 %v6228_v43  ;;  %v6229_v35 = vunpack.i.l.bf16 %v6228_v43 }
 0xbf8   :  { %v6180_v47 = vpack.c.bf16 %v6230_v44, %v6229_v35 }
 0xbfa   :  { %6181 = vmatprep.subr.bf16.mxu1 %v6180_v47  ;;  %v6233_v13 = vpop.permute.xlu1 %6232 }
 0xbfb   :  { %6183 = vmatpush3.bf16.msra.mxu1 %v6180_v47 }
 0xc45   :  { %v4651_v56 = vpop.f32.mrb[28].mxu1 }
 0xc46   :  { %v6098_v0 = vpop.f32.mrb[29].mxu1 }
 0xc47   :  { %v4724_v57 = vpop.f32.mrb[28].mxu0 }
 0xc48   :  { %v6103_v3 = vpop.f32.mrb[29].mxu0 }
 0xc4b   :  { %v4797_v62 = vpop.f32.mrb[30].mxu1 }
 0xc4c   :  { %v5166_v28 = vcombine.low %v4651_v56, %v4797_v62  ;;  %v5167_v8 = vcombine.high %v4651_v56, %v4797_v62  ;;  %v6108_v20 = vpop.f32.mrb[31].mxu1  ;;  %v6235_v56 = vunpack.i.h.bf16 %v6233_v13 }
 0xc4e   :  { %v5174_v18 = vrot.slane %v5166_v28, %v6560_v46  ;;  %v5181_v49 = vrot.slane %v5167_v8, %v6560_v46 }
 0xc4f   :  { %v4870_v45 = vpop.f32.mrb[30].mxu0 }
 0xc50   :  { %v5182_v9 = vcombine.low %v4724_v57, %v4870_v45  ;;  %v5183_v48 = vcombine.high %v4724_v57, %v4870_v45  ;;  %v6113_v40 = vpop.f32.mrb[31].mxu0  ;;  %v6234_v57 = vunpack.i.l.bf16 %v6233_v13 }
 0xc52   :  { %v5190_v50 = vrot.slane %v5182_v9, %v6560_v46  ;;  %v5197_v5 = vrot.slane %v5183_v48, %v6560_v46  ;;  %v6184_v35 = vpack.c.bf16 %v6235_v56, %v6234_v57  ;;  %v7346_v57 = vld [vmem:[#allocation7 + $0x8] sm:$0xff] }
 0xc54   :  { %v5198_v51 = vcombine.low %v5174_v18, %v5190_v50  ;;  %v5199_v10 = vcombine.high %v5174_v18, %v5190_v50  ;;  %v5214_v42 = vcombine.low %v5181_v49, %v5197_v5  ;;  %v5215_v54 = vcombine.high %v5181_v49, %v5197_v5  ;;  %6185 = vmatprep.subr.bf16.mxu1 %v6184_v35 }
 0xc55   :  { %6187 = vmatpush3.bf16.msra.mxu1 %v6184_v35 }
 0xc56   :  { %v5206_v41 = vrot.slane %v5198_v51, %v6565_v55  ;;  %v5213_v30 = vrot.slane %v5199_v10, %v6565_v55  ;;  %v5222_v32 = vrot.slane %v5214_v42, %v6565_v55  ;;  %v5229_v6 = vrot.slane %v5215_v54, %v6565_v55 }
 0xc58   :  { %v5302_v59 = vcombine.low %v5206_v41, %v5213_v30  ;;  %v5834_v60 = vcombine.high %v5206_v41, %v5213_v30  ;;  %v5318_v26 = vcombine.low %v5222_v32, %v5229_v6  ;;  %v5835_v7 = vcombine.high %v5222_v32, %v5229_v6 }
 0xc5a   :  { %v5309_v34 = vrot.slane %v5302_v59, %v6560_v46  ;;  %v5317_v12 = vrot.slane %v5834_v60, %v6560_v46  ;;  %v5325_v52 = vrot.slane %v5318_v26, %v6560_v46  ;;  %v5333_v14 = vrot.slane %v5835_v7, %v6560_v46 }
 0xc5c   :  { %v5334_v15 = vcombine.low %v5309_v34, %v5317_v12  ;;  %v5350_v19 = vcombine.low %v5325_v52, %v5333_v14  ;;  %v5335_v27 = vcombine.high %v5309_v34, %v5317_v12  ;;  %v5351_v24 = vcombine.high %v5325_v52, %v5333_v14 }
 0xc5e   :  { %v7305_v38 = vrot.slane %v5334_v15, %v6565_v55  ;;  %v7308_v22 = vrot.slane %v5350_v19, %v6565_v55  ;;  %v5349_v36 = vrot.slane %v5335_v27, %v6565_v55  ;;  %v5365_v63 = vrot.slane %v5351_v24, %v6565_v55 }
 0xc60   :  { %v5367_v16 = vcombine.high %v7305_v38, %v7308_v22  ;;  %v5368_v53 = vcombine.low %v5349_v36, %v5365_v63  ;;  %v5369_v23 = vcombine.high %v5349_v36, %v5365_v63  ;;  %v5366_v29 = vcombine.low %v7305_v38, %v7308_v22 }
 0xc62   :  { %5440 = vrot.lane.b32.xlu0 %v5367_v16, %s6419_s9 }
 0xc65   :  { %v4943_v37 = vpop.f32.mrb[32].mxu1  ;;  %v5016_v25 = vpop.f32.mrb[32].mxu0 }
 0xc66   :  { %5448 = vrot.lane.b32.xlu0 %v5368_v53, %s6432_s29  ;;  %v6118_v39 = vpop.f32.mrb[33].mxu1  ;;  %v6123_v33 = vpop.f32.mrb[33].mxu0 }
 0xc69   :  { %v5089_v0 = vpop.f32.mrb[34].mxu1  ;;  %v5162_v3 = vpop.f32.mrb[34].mxu0 }
 0xc6a   :  { %5456 = vrot.lane.b32.xlu0 %v5369_v23, %s6416_s23  ;;  %v5234_v62 = vcombine.low %v4943_v37, %v5089_v0  ;;  %v5235_v28 = vcombine.high %v4943_v37, %v5089_v0  ;;  %v5250_v8 = vcombine.low %v5016_v25, %v5162_v3  ;;  %v5251_v20 = vcombine.high %v5016_v25, %v5162_v3  ;;  %v6128_v43 = vpop.f32.mrb[35].mxu1  ;;  %v6133_v44 = vpop.f32.mrb[35].mxu0 }
 0xc6c   :  { %v5242_v45 = vrot.slane %v5234_v62, %v6560_v46  ;;  %v5249_v47 = vrot.slane %v5235_v28, %v6560_v46  ;;  %v5258_v9 = vrot.slane %v5250_v8, %v6560_v46  ;;  %v5265_v48 = vrot.slane %v5251_v20, %v6560_v46 }
 0xc6e   :  { %v5266_v40 = vcombine.low %v5242_v45, %v5258_v9  ;;  %v5267_v18 = vcombine.high %v5242_v45, %v5258_v9  ;;  %v5282_v49 = vcombine.low %v5249_v47, %v5265_v48  ;;  %v5283_v50 = vcombine.high %v5249_v47, %v5265_v48 }
 0xc70   :  { %v5274_v5 = vrot.slane %v5266_v40, %v6565_v55  ;;  %v5281_v51 = vrot.slane %v5267_v18, %v6565_v55  ;;  %v5290_v10 = vrot.slane %v5282_v49, %v6565_v55  ;;  %v5297_v42 = vrot.slane %v5283_v50, %v6565_v55  ;;  %v65_v50 = vld [vmem:[#allocation5 + $0x28] sm:$0xff] }
 0xc72   :  { %v5370_v54 = vcombine.low %v5274_v5, %v5281_v51  ;;  %v5836_v41 = vcombine.high %v5274_v5, %v5281_v51  ;;  %v5386_v30 = vcombine.low %v5290_v10, %v5297_v42  ;;  %v5837_v32 = vcombine.high %v5290_v10, %v5297_v42  ;;  %v68_v51 = vld [vmem:[#allocation5 + $0x40] sm:$0xff]  ;;  %v71_v10 = vld [vmem:[#allocation5 + $0x58] sm:$0xff] }
 0xc73   :  { %v6192_v42 = vpack.c.bf16 %v71_v10, %v68_v51 }
 0xc74   :  { %v5377_v6 = vrot.slane %v5370_v54, %v6560_v46  ;;  %v5385_v59 = vrot.slane %v5836_v41, %v6560_v46  ;;  %v5393_v60 = vrot.slane %v5386_v30, %v6560_v46  ;;  %v5401_v26 = vrot.slane %v5837_v32, %v6560_v46 }
 0xc76   :  { %v5402_v7 = vcombine.low %v5377_v6, %v5385_v59  ;;  %v5418_v34 = vcombine.low %v5393_v60, %v5401_v26  ;;  %v5403_v12 = vcombine.high %v5377_v6, %v5385_v59  ;;  %v5419_v52 = vcombine.high %v5393_v60, %v5401_v26 }
 0xc77   :  { %v5594_v60 = vrot.slane %v7346_v57, %v196_v31  ;;  %v5608_v31 = vrot.slane %v7346_v57, %v2841_v61 }
 0xc78   :  { %v5410_v14 = vrot.slane %v5402_v7, %v6565_v55  ;;  %v5426_v15 = vrot.slane %v5418_v34, %v6565_v55  ;;  %v5417_v19 = vrot.slane %v5403_v12, %v6565_v55  ;;  %v5433_v27 = vrot.slane %v5419_v52, %v6565_v55 }
 0xc79   :  { %v5602_v7 = vrot.slane %v7346_v57, %v2729_v21 }
 0xc7a   :  { %v5435_v24 = vcombine.high %v5410_v14, %v5426_v15  ;;  %v5436_v38 = vcombine.low %v5417_v19, %v5433_v27  ;;  %v5437_v22 = vcombine.high %v5417_v19, %v5433_v27  ;;  %v5434_v36 = vcombine.low %v5410_v14, %v5426_v15 }
 0xc7c   :  { %5442 = vrot.lane.b32.xlu1 %v5435_v24, %s6419_s9 }
 0xc80   :  { %5450 = vrot.lane.b32.xlu1 %v5436_v38, %s6432_s29 }
 0xc84   :  { %5458 = vrot.lane.b32.xlu1 %v5437_v22, %s6416_s23  ;;  %s6433_s23 = smov [#allocation8]  }
 0xc85   :  { %s5737_s30 = sshll.u32 %s6433_s23, 4  ;;  %s5738_s30 = int_to_ptr.vmem [resolvable:$true] %s5737_s30 }
 0xc86   :  { %s6386_s4 = scalar_lea.vmem %s5738_s30, 256  ;;  %p6391_p11 = scmp.lt.s32.totalorder %s5738_s30, %s5738_s30 }
 0xc87   :  { %p6387_p10 = scmp.ne.s32.totalorder %s5738_s30, %s6386_s4  ;;  %p6392_p12 = scmp.lt.s32.totalorder %s6386_s4, %s6386_s4 }
 0xc89   :  { %p6393_p13 = por %p6392_p12, %p6391_p11 }
 0xc8b   :  { %p6394_p0 = pnand %p6393_p13, %p6387_p10 }
 0xcd4   :  { %v5441_v46 = vpop.permute.xlu0 %5440 }
 0xcd5   :  { %v5462_v16 = vsel %vm1126_vm2, %v5366_v29, %v5441_v46  ;;  %v5471_v29 = vrot.slane %v7346_v57, %v186_v2 }
 0xcd8   :  { %v5449_v63 = vpop.permute.xlu0 %5448 }
 0xcd9   :  { %v5464_v53 = vsel %vm2721_vm4, %v5462_v16, %v5449_v63 }
 0xcdc   :  { %v5457_v23 = vpop.permute.xlu0 %5456 }
 0xcdd   :  { %v5466_v37 = vsel %vm2724_vm5, %v5464_v53, %v5457_v23 }
 0xcde   :  { %6142 = vmatprep.mubr.msk.f32.mxu1 %vm80_vm0, %v5466_v37 }
 0xcee   :  { %v5443_v55 = vpop.permute.xlu1 %5442 }
 0xcef   :  { %v5463_v39 = vsel %vm1126_vm2, %v5434_v36, %v5443_v55 }
 0xcf2   :  { %v5451_v25 = vpop.permute.xlu1 %5450 }
 0xcf3   :  { %v5465_v33 = vsel %vm2721_vm4, %v5463_v39, %v5451_v25 }
 0xcf6   :  { %v5459_v13 = vpop.permute.xlu1 %5458 }
 0xcf7   :  { %v5467_v56 = vsel %vm2724_vm5, %v5465_v33, %v5459_v13 }
 0xcf8   :  { %6143 = vmatmul.mubr.msk.f32.vlgmr.msra.gmra.mrb[36].mxu1 %vm80_vm0, %v5467_v56 }
 0xdcb   :  { %v6144_v0 = vpop.f32.mrb[36].mxu1 }
 0xdcc   :  { %v5562_v3 = vadd.f32 %v6144_v0, %v5471_v29  ;;  %v5556_v62 = vpop.f32.mrb[37].mxu1 }
 0xdcd   :  { %v5557_v28 = vadd.f32 %v5556_v62, %v5471_v29 }
 0xdce   :  { %v5566_v8 = vadd.f32 %v5562_v3, %v6990_v4 }
 0xdcf   :  { %v5565_v20 = vadd.f32 %v5557_v28, %v6988_v58  ;;  %v62_v58 = vld [vmem:[#allocation5 + $0x10] sm:$0xff] }
 0xdd0   :  { %v5570_v43 = vsel %vm80_vm0, %v5566_v8, 0.0  ;;  %v6188_v5 = vpack.c.bf16 %v65_v50, %v62_v58 }
 0xdd1   :  { %5571 = vadd.xlane.f32.xlu1 %v5570_v43  ;;  %v5567_v44 = vsel %vm80_vm0, %v5565_v20, 0.0 }
 0xdd2   :  { %5568 = vadd.xlane.f32.xlu0 %v5567_v44  ;;  %6189 = vmatprep.subr.bf16.mxu0 %v6188_v5 }
 0xdd3   :  { %6191 = vmatpush3.bf16.msra.mxu0 %v6188_v5 }
 0xdd4   :  { %6193 = vmatprep.subr.bf16.mxu0 %v6192_v42 }
 0xdd7   :  { %6195 = vmatpush3.bf16.msra.mxu0 %v6192_v42 }
 0xe5e   :  { %v5572_v35 = vpop.xlane.xlu1 %5571 }
 0xe5f   :  { %v5574_v45 = vmul.f32 0.03125, %v5572_v35  ;;  %v5569_v47 = vpop.xlane.xlu0 %5568  ;;  %v5727_v35 = vrot.slane %v7346_v57, %v2952_v17 }
 0xe60   :  { %v5573_v9 = vmul.f32 0.03125, %v5569_v47 }
 0xe61   :  { %v5576_v48 = vsub.f32 %v5566_v8, %v5574_v45 }
 0xe62   :  { %v5575_v2 = vsub.f32 %v5565_v20, %v5573_v9  ;;  %v5719_v20 = vrot.slane %v7346_v57, %v2849_v11 }
 0xe63   :  { %v5578_v49 = vmul.f32 %v5576_v48, %v5576_v48 }
 0xe64   :  { %v5577_v40 = vmul.f32 %v5575_v2, %v5575_v2 }
 0xe65   :  { %v5582_v4 = vsel %vm80_vm0, %v5578_v49, 0.0 }
 0xe66   :  { %v5579_v18 = vsel %vm80_vm0, %v5577_v40, 0.0 }
 0xe67   :  { %5580 = vadd.xlane.f32.xlu0 %v5579_v18 }
 0xe6b   :  { %5583 = vadd.xlane.f32.xlu0 %v5582_v4 }
 0xef4   :  { %v5581_v54 = vpop.xlane.xlu0 %5580 }
 0xef5   :  { %v5585_v41 = vmul.f32 0.032258064, %v5581_v54 }
 0xef7   :  { %v5587_v30 = vadd.f32 1e-12, %v5585_v41 }
 0xef8   :  { %v5584_v32 = vpop.xlane.xlu0 %5583 }
 0xef9   :  { %6304 = vrsqrt.f32 %v5587_v30  ;;  %v5586_v6 = vmul.f32 0.032258064, %v5584_v32 }
 0xefb   :  { %v5588_v59 = vadd.f32 1e-12, %v5586_v6 }
 0xefd   :  { %6306 = vrsqrt.f32 %v5588_v59 }
 0xf03   :  { %v6305_v26 = vpop.eup %6304 }
 0xf04   :  { %v5595_v34 = vmul.f32 %v6305_v26, %v5594_v60 }
 0xf06   :  { %v5597_v12 = vmul.f32 %v5595_v34, %v5575_v2 }
 0xf07   :  { %v6307_v52 = vpop.eup %6306 }
 0xf08   :  { %v5596_v14 = vmul.f32 %v6307_v52, %v5594_v60  ;;  %v5603_v15 = vadd.f32 %v5602_v7, %v5597_v12 }
 0xf0a   :  { %6153 = vmatprep.mubr.msk.f32.mxu0 %vm80_vm0, %v5603_v15  ;;  %v5598_v19 = vmul.f32 %v5596_v14, %v5576_v48 }
 0xf0c   :  { %v5604_v27 = vadd.f32 %v5602_v7, %v5598_v19 }
 0xf0e   :  { %6154 = vmatmul.mubr.msk.f32.vlgmr.msra.gmra.mrb[36].mxu0 %vm80_vm0, %v5604_v27 }
 0xfe1   :  { %v6155_v24 = vpop.f32.mrb[36].mxu0 }
 0xfe2   :  { %v5687_v38 = vadd.f32 %v6155_v24, %v5608_v31  ;;  %v5681_v22 = vpop.f32.mrb[37].mxu0 }
 0xfe3   :  { %v5682_v36 = vadd.f32 %v5681_v22, %v5608_v31 }
 0xfe4   :  { %v5691_v21 = vadd.f32 %v5687_v38, %v5604_v27 }
 0xfe5   :  { %v5690_v46 = vadd.f32 %v5682_v36, %v5603_v15 }
 0xfe6   :  { %v5695_v63 = vsel %vm80_vm0, %v5691_v21, 0.0 }
 0xfe7   :  { %5696 = vadd.xlane.f32.xlu0 %v5695_v63  ;;  %v5692_v16 = vsel %vm80_vm0, %v5690_v46, 0.0 }
 0xfe8   :  { %5693 = vadd.xlane.f32.xlu1 %v5692_v16 }
0x1074   :  { %v5697_v53 = vpop.xlane.xlu0 %5696 }
0x1075   :  { %v5699_v23 = vmul.f32 0.03125, %v5697_v53  ;;  %v5694_v37 = vpop.xlane.xlu1 %5693 }
0x1076   :  { %v5698_v55 = vmul.f32 0.03125, %v5694_v37 }
0x1077   :  { %v5701_v25 = vsub.f32 %v5691_v21, %v5699_v23 }
0x1078   :  { %v5700_v39 = vsub.f32 %v5690_v46, %v5698_v55 }
0x1079   :  { %v5703_v33 = vmul.f32 %v5701_v25, %v5701_v25 }
0x107a   :  { %v5702_v61 = vmul.f32 %v5700_v39, %v5700_v39 }
0x107b   :  { %v5707_v13 = vsel %vm80_vm0, %v5703_v33, 0.0 }
0x107c   :  { %5708 = vadd.xlane.f32.xlu0 %v5707_v13  ;;  %v5704_v56 = vsel %vm80_vm0, %v5702_v61, 0.0 }
0x107d   :  { %5705 = vadd.xlane.f32.xlu1 %v5704_v56 }
0x1109   :  { %v5709_v29 = vpop.xlane.xlu0 %5708 }
0x110a   :  { %v5711_v0 = vmul.f32 0.032258064, %v5709_v29  ;;  %v5706_v3 = vpop.xlane.xlu1 %5705 }
0x110b   :  { %v5710_v62 = vmul.f32 0.032258064, %v5706_v3 }
0x110c   :  { %v5713_v28 = vadd.f32 1e-12, %v5711_v0 }
0x110d   :  { %v5712_v8 = vadd.f32 1e-12, %v5710_v62 }
0x110e   :  { %6308 = vrsqrt.f32 %v5713_v28 }
0x110f   :  { %6310 = vrsqrt.f32 %v5712_v8 }
0x1118   :  { %v6309_v43 = vpop.eup %6308 }
0x1119   :  { %v6311_v44 = vpop.eup %6310  ;;  %v5721_v45 = vmul.f32 %v6309_v43, %v5719_v20 }
0x111a   :  { %v5720_v47 = vmul.f32 %v6311_v44, %v5719_v20 }
0x111b   :  { %v5723_v9 = vmul.f32 %v5721_v45, %v5701_v25 }
0x111c   :  { %v5722_v48 = vmul.f32 %v5720_v47, %v5700_v39 }
0x111d   :  { %v5729_v2 = vadd.f32 %v5727_v35, %v5723_v9 }
0x111e   :  { %v5728_v40 = vadd.f32 %v5727_v35, %v5722_v48 }
0x111f   :  { %5731 = vst.msk [vmem:[#allocation8 + $0x8] sm:$0xff] %vm80_vm0, %v5729_v2 }
0x1120   :  { %5730 = vst.msk [vmem:[#allocation8] sm:$0xff] %vm80_vm0, %v5728_v40 }
0x1121   :  { %6397 = shalt.err (!%p6394_p0)
}
0x1122   :  { %s6398_s7 = scalar_lea.hbm %s7398_s3, 256 }
0x1123   :  { %p6399_p1 = scmp.ne.s32.totalorder %s7398_s3, %s6398_s7  ;;  %p6402_p2 = scmp.lt.u32.totalorder %s6398_s7, %s7398_s3 }
0x1125   :  { %p6404_p3 = pnand %p6402_p2, %p6399_p1 }
0x1127   :  { %6407 = shalt.err (!%p6404_p3)
}
0x1128   :  { %5743 = dma.vmem_to_hbm [thread:$0]  %s5738_s30, 256, %s7398_s3, [#allocation4], %s6418_s1, %s6418_s1, %s6419_s9  }
0x1129   :  { %6412 = dma.done.wait [#allocation4], 256  }
0x112a   :  { %6413 = vsyncadd [#allocation4], 4294967040 }
0x112b   :  { %5747 = vsyncpa [#allocation3], 1 }
0x112c   :  { %5748 = vsyncpa [#allocation6], 1 }
0x112d   :  { %5749 = vsyncpa [#allocation4], 1 }

</bundles_post_ra>
